<compile_context>
chip_gen: v7x
topology: tpu7x:2x2x1
jax: 0.10.0
libtpu: 0.0.40
codegen_flags: <defaults>
</compile_context>

<pallas_src>
import numpy as np
import jax
import jax.numpy as jnp
from jax.experimental import pallas as pl
from jax.experimental.pallas import tpu as pltpu

# ----- fixed module hyper-parameters (from main4.__init__) -----
C_IN = 90
C_INP = 96          # zero-padded channels (bf16 sublane tile = 16)
C_OUT = 40
KSIZE = 6
PAD = 1
BN_EPS = 1e-5
LANE = 128
MP = 128            # lane margin for shifted views (keeps concat 128-aligned)


def _round_up(a, b):
    return (a + b - 1) // b * b


def _avgpool_matrix(in_size: int, k: int) -> np.ndarray:
    """AvgPool1d(kernel=k, stride=k) as a (out, in) linear map."""
    out = in_size // k
    P = np.zeros((out, in_size), dtype=np.float32)
    for i in range(out):
        P[i, i * k:(i + 1) * k] = 1.0 / k
    return P


def _linear_interp_matrix(in_size: int, out_size: int) -> np.ndarray:
    """F.interpolate(mode='linear', align_corners=False) as (out, in) map."""
    M = np.zeros((out_size, in_size), dtype=np.float32)
    scale = in_size / out_size
    for i in range(out_size):
        src = max((i + 0.5) * scale - 0.5, 0.0)
        i0 = min(int(np.floor(src)), in_size - 1)
        i1 = min(i0 + 1, in_size - 1)
        w1 = src - i0
        M[i, i0] += 1.0 - w1
        M[i, i1] += w1
    return M


def _band_decompose(A: np.ndarray):
    """Dense (L, L) map -> (offsets, weights[n_off, L]) with A[l, l+off] = w[d, l]."""
    L = A.shape[0]
    rnz, cnz = np.nonzero(A)
    offs = sorted({int(j - i) for i, j in zip(rnz, cnz)})
    w = np.zeros((len(offs), L), dtype=np.float32)
    for d, off in enumerate(offs):
        lo, hi = max(0, -off), min(L, L - off)
        idx = np.arange(lo, hi)
        w[d, idx] = A[idx, idx + off]
    return offs, w


def make_main4_pallas(L_in: int, block_n: int = 8):
    """Builds the pallas_call wrapper for a fixed input length."""
    L_out = L_in + 2 * PAD - KSIZE + 1          # stride 1
    L_outP = _round_up(L_out, LANE)             # lane-dense padded output length
    S = _round_up(L_in + 2 * PAD, LANE)         # per-sample segment stride (>= L_outP)

    # avgpool -> linear-interp folded into (L_out, L_out) maps, then banded.
    A2 = _linear_interp_matrix(L_out // 2, L_out) @ _avgpool_matrix(L_out, 2)
    A3 = _linear_interp_matrix(L_out // 3, L_out) @ _avgpool_matrix(L_out, 3)
    offs2, bw2 = _band_decompose(A2)
    offs3, bw3 = _band_decompose(A3)
    assert max(abs(o) for o in (offs2 + offs3)) < MP and (KSIZE - 1) < MP

    # per-segment band weights; zero beyond L_out (masks garbage/padded lanes)
    seg2 = np.zeros((len(offs2), S), np.float32); seg2[:, :L_out] = bw2
    seg3 = np.zeros((len(offs3), S), np.float32); seg3[:, :L_out] = bw3
    n2, n3 = len(offs2), len(offs3)

    def _fold(conv_w, conv_b, bn_gamma, bn_beta, bn_mean, bn_var):
        """Fold conv bias + BatchNorm(eval) into weight scale / shift; stack taps."""
        inv_std = 1.0 / jnp.sqrt(bn_var.astype(jnp.float32) + BN_EPS)
        scale = bn_gamma.astype(jnp.float32) * inv_std
        shift = ((conv_b.astype(jnp.float32) - bn_mean.astype(jnp.float32)) * scale
                 + bn_beta.astype(jnp.float32))
        # W_stack[k*C_OUT + co, ci] = scale[co] * conv_w[co, ci, k]
        w = conv_w.astype(jnp.float32) * scale[:, None, None]          # (40, 90, 6)
        w = jnp.transpose(w, (2, 0, 1)).reshape(KSIZE * C_OUT, C_IN)   # (240, 90)
        w = jnp.pad(w, ((0, 0), (0, C_INP - C_IN))).astype(jnp.bfloat16)
        return w, shift.reshape(C_OUT, 1)

    def forward(x_ncl, conv_w, conv_b, bn_gamma, bn_beta, bn_mean, bn_var):
        """x_ncl: (N, 90, L_in) float32 -> (N, 120, L_out) float32 (NCL)."""
        N = x_ncl.shape[0]

        # batch-tile size: >=2 grid tiles when N>=2 (v7x has 2 TCs) + VMEM budget.
        per_sample = S * (C_INP * 2 * 2 + 3 * C_OUT * 4 * 2
                          + KSIZE * C_OUT * 4 * 2 + C_OUT * 4 * 8)
        b_mem = max(1, (32 * 1024 * 1024) // per_sample)
        B = int(max(1, min(block_n, -(-N // 2), b_mem)))
        n_tiles = pl.cdiv(N, B)
        N_pad = n_tiles * B
        WL = B * S

        w_stack, shift = _fold(conv_w, conv_b, bn_gamma, bn_beta, bn_mean, bn_var)
        band2 = jnp.asarray(np.tile(seg2, (1, B)))     # (n2, B*S)
        band3 = jnp.asarray(np.tile(seg3, (1, B)))     # (n3, B*S)

        # channel-major input slab (C_INP, N_pad*S) bf16; sample b at lanes [b*S, b*S+L_in+2)
        xp = jnp.pad(x_ncl.astype(jnp.float32),
                     ((0, N_pad - N), (0, C_INP - C_IN), (PAD, S - L_in - PAD)))
        x_slab = jnp.transpose(xp, (1, 0, 2)).reshape(C_INP, N_pad * S)
        x_slab = x_slab.astype(jnp.bfloat16)

        def kernel(x_ref, w_ref, shift_ref, b2_ref, b3_ref, o_ref):
            # x_ref: (96, WL) bf16    w_ref: (240, 96) bf16   shift_ref: (40, 1) f32
            # b2_ref/b3_ref: (n_off, WL) f32    o_ref: (B, 120, L_outP) f32
            # One fat matmul: all 6 conv taps stacked on the M dim.
            xw = jnp.dot(w_ref[...], x_ref[...],
                         preferred_element_type=jnp.float32)            # (240, WL)
            lz = jnp.zeros((KSIZE * C_OUT, MP), jnp.float32)
            rz = jnp.zeros((KSIZE * C_OUT, 2 * MP), jnp.float32)
            ycat = jnp.concatenate([lz, xw, rz], axis=1)                # (240, WL+3*MP)
            WE = WL + 2 * MP
            # tap sum: 5 lane-shifted adds (VPU); column MP+p of yext == conv output p
            ysum = ycat[0:C_OUT, 0:WE]
            for k in range(1, KSIZE):
                ysum = ysum + ycat[k * C_OUT:(k + 1) * C_OUT, k:k + WE]
            yext = jnp.maximum(ysum + shift_ref[...], 0.0)              # (40, WE) f32
            y1 = yext[:, MP:MP + WL]                                    # conv+BN+ReLU
            # banded avgpool+interp branches: few lane-shifted weighted adds, f32
            b2 = b2_ref[...]
            y2 = jnp.zeros_like(y1)
            for d, off in enumerate(offs2):
                y2 = y2 + b2[d:d + 1, :] * yext[:, MP + off:MP + off + WL]
            b3 = b3_ref[...]
            y3 = jnp.zeros_like(y1)
            for d, off in enumerate(offs3):
                y3 = y3 + b3[d:d + 1, :] * yext[:, MP + off:MP + off + WL]
            # lane-dense stores: per-sample 128-aligned windows, sublane offsets 0/40/80
            for b in range(B):
                s0 = b * S
                o_ref[b, 0:C_OUT, :] = y1[:, s0:s0 + L_outP]
                o_ref[b, C_OUT:2 * C_OUT, :] = y2[:, s0:s0 + L_outP]
                o_ref[b, 2 * C_OUT:3 * C_OUT, :] = y3[:, s0:s0 + L_outP]

        const = dict(pipeline_mode=pl.Buffered(1))   # grid-invariant -> single buffer
        out = pl.pallas_call(
            kernel,
            out_shape=jax.ShapeDtypeStruct((N_pad, 3 * C_OUT, L_outP), jnp.float32),
            grid=(n_tiles,),
            in_specs=[
                pl.BlockSpec((C_INP, WL), lambda n: (0, n)),
                pl.BlockSpec((KSIZE * C_OUT, C_INP), lambda n: (0, 0), **const),
                pl.BlockSpec((C_OUT, 1), lambda n: (0, 0), **const),
                pl.BlockSpec((n2, WL), lambda n: (0, 0), **const),
                pl.BlockSpec((n3, WL), lambda n: (0, 0), **const),
            ],
            out_specs=pl.BlockSpec((B, 3 * C_OUT, L_outP), lambda n: (n, 0, 0)),
            compiler_params=pltpu.CompilerParams(
                dimension_semantics=("parallel",),
                vmem_limit_bytes=48 * 1024 * 1024),
        )(x_slab, w_stack, shift, band2, band3)

        return out[:N, :, :L_out]

    def reference(x_ncl, conv_w, conv_b, bn_gamma, bn_beta, bn_mean, bn_var):
        """Pure-JAX f32 reference (same bf16 rounding of conv operands as the kernel)."""
        hi = jax.lax.Precision.HIGHEST
        inv_std = 1.0 / jnp.sqrt(bn_var.astype(jnp.float32) + BN_EPS)
        scale = bn_gamma.astype(jnp.float32) * inv_std
        shift = ((conv_b.astype(jnp.float32) - bn_mean.astype(jnp.float32)) * scale
                 + bn_beta.astype(jnp.float32))
        xp = jnp.pad(x_ncl.astype(jnp.float32), ((0, 0), (0, 0), (PAD, PAD)))
        xpb = xp.astype(jnp.bfloat16).astype(jnp.float32)
        wsc = (conv_w.astype(jnp.float32) * scale[:, None, None])
        wsc = wsc.astype(jnp.bfloat16).astype(jnp.float32)
        cols = jnp.stack([xpb[:, :, k:k + L_out] for k in range(KSIZE)], axis=1)
        y = jnp.einsum('oik,nkil->nol', wsc, cols, precision=hi) + shift[None, :, None]
        y = jnp.maximum(y, 0.0)
        y2 = jnp.einsum('ncl,ml->ncm', y, jnp.asarray(A2), precision=hi)
        y3 = jnp.einsum('ncl,ml->ncm', y, jnp.asarray(A3), precision=hi)
        return jnp.concatenate([y, y2, y3], axis=1)

    return forward, reference, L_out


if __name__ == "__main__":
    # Small, deterministic setup: batch=2, in_channels=90 (fixed by module), L=16.
    N, L_IN = 2, 16
    key = jax.random.PRNGKey(0)
    kx, kw, kb, kg, kbe = jax.random.split(key, 5)

    x = jax.random.normal(kx, (N, C_IN, L_IN), dtype=jnp.float32)

    # Deterministic parameter init (synthetic, not a checkpoint).
    conv_w = 0.05 * jax.random.normal(kw, (C_OUT, C_IN, KSIZE), dtype=jnp.float32)
    conv_b = 0.05 * jax.random.normal(kb, (C_OUT,), dtype=jnp.float32)
    bn_gamma = 1.0 + 0.1 * jax.random.normal(kg, (C_OUT,), dtype=jnp.float32)
    bn_beta = 0.1 * jax.random.normal(kbe, (C_OUT,), dtype=jnp.float32)
    bn_mean = jnp.zeros((C_OUT,), jnp.float32)
    bn_var = jnp.ones((C_OUT,), jnp.float32)

    forward, reference, L_out = make_main4_pallas(L_IN, block_n=8)

    out = forward(x, conv_w, conv_b, bn_gamma, bn_beta, bn_mean, bn_var)
    out = jax.block_until_ready(out)
    assert out.shape == (N, 3 * C_OUT, L_out), out.shape

    ref = reference(x, conv_w, conv_b, bn_gamma, bn_beta, bn_mean, bn_var)
    ref = jax.block_until_ready(ref)
    np.testing.assert_allclose(np.asarray(out), np.asarray(ref),
                               rtol=5e-3, atol=5e-3)

    print("KERNEL_OK")
</pallas_src>

<mosaic_0001>
module attributes {stable_mosaic.version = 11 : i64} {
  func.func @kernel(%arg0: i32, %arg1: memref<96x128xbf16, #tpu.memory_space<vmem>>, %arg2: memref<240x96xbf16, #tpu.memory_space<vmem>>, %arg3: memref<40x1xf32, #tpu.memory_space<vmem>>, %arg4: memref<6x128xf32, #tpu.memory_space<vmem>>, %arg5: memref<8x128xf32, #tpu.memory_space<vmem>>, %arg6: memref<1x120x128xf32, #tpu.memory_space<vmem>>) attributes {dimension_semantics = [#tpu.dimension_semantics<parallel>], iteration_bounds = array<i64: 2>, scalar_prefetch = 0 : i64, scratch_operands = 0 : i64, tpu.core_type = #tpu.core_type<tc>, window_params = [{transform_indices = @transform_0, window_bounds = array<i64: 96, 128>}, {pipeline_mode = #tpu.pipeline_mode<synchronous>, transform_indices = @transform_1, window_bounds = array<i64: 240, 96>}, {pipeline_mode = #tpu.pipeline_mode<synchronous>, transform_indices = @transform_2, window_bounds = array<i64: 40, 1>}, {pipeline_mode = #tpu.pipeline_mode<synchronous>, transform_indices = @transform_3, window_bounds = array<i64: 6, 128>}, {pipeline_mode = #tpu.pipeline_mode<synchronous>, transform_indices = @transform_4, window_bounds = array<i64: 8, 128>}, {transform_indices = @transform_5, window_bounds = array<i64: 1, 120, 128>}]} {
    %c0 = arith.constant 0 : index
    %c0_0 = arith.constant 0 : index
    %0 = vector.load %arg2[%c0, %c0_0] : memref<240x96xbf16, #tpu.memory_space<vmem>>, vector<240x96xbf16>
    %c0_1 = arith.constant 0 : index
    %c0_2 = arith.constant 0 : index
    %1 = vector.load %arg1[%c0_1, %c0_2] : memref<96x128xbf16, #tpu.memory_space<vmem>>, vector<96x128xbf16>
    %cst = arith.constant dense<0.000000e+00> : vector<240x128xf32>
    %2 = tpu.matmul %0, %1, %cst {dimension_numbers = #tpu.dot_dimension_numbers<[1], [0], [0], [1], [0, 0, 1, 1], [], []>} : vector<240x96xbf16>, vector<96x128xbf16>, vector<240x128xf32> -> vector<240x128xf32>
    %cst_3 = arith.constant 0.000000e+00 : f32
    %3 = vector.broadcast %cst_3 : f32 to vector<240x128xf32>
    %cst_4 = arith.constant 0.000000e+00 : f32
    %4 = vector.broadcast %cst_4 : f32 to vector<240x256xf32>
    %5 = tpu.concatenate %3, %2, %4 in 1 : vector<240x128xf32>, vector<240x128xf32>, vector<240x256xf32> -> vector<240x512xf32>
    %6 = vector.extract_strided_slice %5 {offsets = [0, 0], sizes = [40, 384], strides = [1, 1]} : vector<240x512xf32> to vector<40x384xf32>
    %7 = vector.extract_strided_slice %5 {offsets = [40, 1], sizes = [40, 384], strides = [1, 1]} : vector<240x512xf32> to vector<40x384xf32>
    %8 = arith.addf %6, %7 : vector<40x384xf32>
    %9 = vector.extract_strided_slice %5 {offsets = [80, 2], sizes = [40, 384], strides = [1, 1]} : vector<240x512xf32> to vector<40x384xf32>
    %10 = arith.addf %8, %9 : vector<40x384xf32>
    %11 = vector.extract_strided_slice %5 {offsets = [120, 3], sizes = [40, 384], strides = [1, 1]} : vector<240x512xf32> to vector<40x384xf32>
    %12 = arith.addf %10, %11 : vector<40x384xf32>
    %13 = vector.extract_strided_slice %5 {offsets = [160, 4], sizes = [40, 384], strides = [1, 1]} : vector<240x512xf32> to vector<40x384xf32>
    %14 = arith.addf %12, %13 : vector<40x384xf32>
    %15 = vector.extract_strided_slice %5 {offsets = [200, 5], sizes = [40, 384], strides = [1, 1]} : vector<240x512xf32> to vector<40x384xf32>
    %16 = arith.addf %14, %15 : vector<40x384xf32>
    %c0_5 = arith.constant 0 : index
    %c0_6 = arith.constant 0 : index
    %17 = vector.load %arg3[%c0_5, %c0_6] : memref<40x1xf32, #tpu.memory_space<vmem>>, vector<40x1xf32>
    %18 = vector.broadcast %17 : vector<40x1xf32> to vector<40x384xf32>
    %19 = arith.addf %16, %18 : vector<40x384xf32>
    %cst_7 = arith.constant 0.000000e+00 : f32
    %20 = vector.broadcast %cst_7 : f32 to vector<40x384xf32>
    %21 = arith.maximumf %19, %20 : vector<40x384xf32>
    %22 = vector.extract_strided_slice %21 {offsets = [0, 128], sizes = [40, 128], strides = [1, 1]} : vector<40x384xf32> to vector<40x128xf32>
    %c0_8 = arith.constant 0 : index
    %c0_9 = arith.constant 0 : index
    %23 = vector.load %arg4[%c0_8, %c0_9] : memref<6x128xf32, #tpu.memory_space<vmem>>, vector<6x128xf32>
    %cst_10 = arith.constant 0.000000e+00 : f32
    %24 = vector.broadcast %cst_10 : f32 to vector<40x128xf32>
    %25 = vector.extract_strided_slice %23 {offsets = [0, 0], sizes = [1, 128], strides = [1, 1]} : vector<6x128xf32> to vector<1x128xf32>
    %26 = vector.extract_strided_slice %21 {offsets = [0, 125], sizes = [40, 128], strides = [1, 1]} : vector<40x384xf32> to vector<40x128xf32>
    %27 = vector.broadcast %25 : vector<1x128xf32> to vector<40x128xf32>
    %28 = arith.mulf %27, %26 : vector<40x128xf32>
    %29 = arith.addf %24, %28 : vector<40x128xf32>
    %30 = vector.extract_strided_slice %23 {offsets = [1, 0], sizes = [1, 128], strides = [1, 1]} : vector<6x128xf32> to vector<1x128xf32>
    %31 = vector.extract_strided_slice %21 {offsets = [0, 126], sizes = [40, 128], strides = [1, 1]} : vector<40x384xf32> to vector<40x128xf32>
    %32 = vector.broadcast %30 : vector<1x128xf32> to vector<40x128xf32>
    %33 = arith.mulf %32, %31 : vector<40x128xf32>
    %34 = arith.addf %29, %33 : vector<40x128xf32>
    %35 = vector.extract_strided_slice %23 {offsets = [2, 0], sizes = [1, 128], strides = [1, 1]} : vector<6x128xf32> to vector<1x128xf32>
    %36 = vector.extract_strided_slice %21 {offsets = [0, 127], sizes = [40, 128], strides = [1, 1]} : vector<40x384xf32> to vector<40x128xf32>
    %37 = vector.broadcast %35 : vector<1x128xf32> to vector<40x128xf32>
    %38 = arith.mulf %37, %36 : vector<40x128xf32>
    %39 = arith.addf %34, %38 : vector<40x128xf32>
    %40 = vector.extract_strided_slice %23 {offsets = [3, 0], sizes = [1, 128], strides = [1, 1]} : vector<6x128xf32> to vector<1x128xf32>
    %41 = vector.extract_strided_slice %21 {offsets = [0, 128], sizes = [40, 128], strides = [1, 1]} : vector<40x384xf32> to vector<40x128xf32>
    %42 = vector.broadcast %40 : vector<1x128xf32> to vector<40x128xf32>
    %43 = arith.mulf %42, %41 : vector<40x128xf32>
    %44 = arith.addf %39, %43 : vector<40x128xf32>
    %45 = vector.extract_strided_slice %23 {offsets = [4, 0], sizes = [1, 128], strides = [1, 1]} : vector<6x128xf32> to vector<1x128xf32>
    %46 = vector.extract_strided_slice %21 {offsets = [0, 129], sizes = [40, 128], strides = [1, 1]} : vector<40x384xf32> to vector<40x128xf32>
    %47 = vector.broadcast %45 : vector<1x128xf32> to vector<40x128xf32>
    %48 = arith.mulf %47, %46 : vector<40x128xf32>
    %49 = arith.addf %44, %48 : vector<40x128xf32>
    %50 = vector.extract_strided_slice %23 {offsets = [5, 0], sizes = [1, 128], strides = [1, 1]} : vector<6x128xf32> to vector<1x128xf32>
    %51 = vector.extract_strided_slice %21 {offsets = [0, 130], sizes = [40, 128], strides = [1, 1]} : vector<40x384xf32> to vector<40x128xf32>
    %52 = vector.broadcast %50 : vector<1x128xf32> to vector<40x128xf32>
    %53 = arith.mulf %52, %51 : vector<40x128xf32>
    %54 = arith.addf %49, %53 : vector<40x128xf32>
    %c0_11 = arith.constant 0 : index
    %c0_12 = arith.constant 0 : index
    %55 = vector.load %arg5[%c0_11, %c0_12] : memref<8x128xf32, #tpu.memory_space<vmem>>, vector<8x128xf32>
    %cst_13 = arith.constant 0.000000e+00 : f32
    %56 = vector.broadcast %cst_13 : f32 to vector<40x128xf32>
    %57 = vector.extract_strided_slice %55 {offsets = [0, 0], sizes = [1, 128], strides = [1, 1]} : vector<8x128xf32> to vector<1x128xf32>
    %58 = vector.extract_strided_slice %21 {offsets = [0, 124], sizes = [40, 128], strides = [1, 1]} : vector<40x384xf32> to vector<40x128xf32>
    %59 = vector.broadcast %57 : vector<1x128xf32> to vector<40x128xf32>
    %60 = arith.mulf %59, %58 : vector<40x128xf32>
    %61 = arith.addf %56, %60 : vector<40x128xf32>
    %62 = vector.extract_strided_slice %55 {offsets = [1, 0], sizes = [1, 128], strides = [1, 1]} : vector<8x128xf32> to vector<1x128xf32>
    %63 = vector.extract_strided_slice %21 {offsets = [0, 125], sizes = [40, 128], strides = [1, 1]} : vector<40x384xf32> to vector<40x128xf32>
    %64 = vector.broadcast %62 : vector<1x128xf32> to vector<40x128xf32>
    %65 = arith.mulf %64, %63 : vector<40x128xf32>
    %66 = arith.addf %61, %65 : vector<40x128xf32>
    %67 = vector.extract_strided_slice %55 {offsets = [2, 0], sizes = [1, 128], strides = [1, 1]} : vector<8x128xf32> to vector<1x128xf32>
    %68 = vector.extract_strided_slice %21 {offsets = [0, 126], sizes = [40, 128], strides = [1, 1]} : vector<40x384xf32> to vector<40x128xf32>
    %69 = vector.broadcast %67 : vector<1x128xf32> to vector<40x128xf32>
    %70 = arith.mulf %69, %68 : vector<40x128xf32>
    %71 = arith.addf %66, %70 : vector<40x128xf32>
    %72 = vector.extract_strided_slice %55 {offsets = [3, 0], sizes = [1, 128], strides = [1, 1]} : vector<8x128xf32> to vector<1x128xf32>
    %73 = vector.extract_strided_slice %21 {offsets = [0, 127], sizes = [40, 128], strides = [1, 1]} : vector<40x384xf32> to vector<40x128xf32>
    %74 = vector.broadcast %72 : vector<1x128xf32> to vector<40x128xf32>
    %75 = arith.mulf %74, %73 : vector<40x128xf32>
    %76 = arith.addf %71, %75 : vector<40x128xf32>
    %77 = vector.extract_strided_slice %55 {offsets = [4, 0], sizes = [1, 128], strides = [1, 1]} : vector<8x128xf32> to vector<1x128xf32>
    %78 = vector.extract_strided_slice %21 {offsets = [0, 128], sizes = [40, 128], strides = [1, 1]} : vector<40x384xf32> to vector<40x128xf32>
    %79 = vector.broadcast %77 : vector<1x128xf32> to vector<40x128xf32>
    %80 = arith.mulf %79, %78 : vector<40x128xf32>
    %81 = arith.addf %76, %80 : vector<40x128xf32>
    %82 = vector.extract_strided_slice %55 {offsets = [5, 0], sizes = [1, 128], strides = [1, 1]} : vector<8x128xf32> to vector<1x128xf32>
    %83 = vector.extract_strided_slice %21 {offsets = [0, 129], sizes = [40, 128], strides = [1, 1]} : vector<40x384xf32> to vector<40x128xf32>
    %84 = vector.broadcast %82 : vector<1x128xf32> to vector<40x128xf32>
    %85 = arith.mulf %84, %83 : vector<40x128xf32>
    %86 = arith.addf %81, %85 : vector<40x128xf32>
    %87 = vector.extract_strided_slice %55 {offsets = [6, 0], sizes = [1, 128], strides = [1, 1]} : vector<8x128xf32> to vector<1x128xf32>
    %88 = vector.extract_strided_slice %21 {offsets = [0, 130], sizes = [40, 128], strides = [1, 1]} : vector<40x384xf32> to vector<40x128xf32>
    %89 = vector.broadcast %87 : vector<1x128xf32> to vector<40x128xf32>
    %90 = arith.mulf %89, %88 : vector<40x128xf32>
    %91 = arith.addf %86, %90 : vector<40x128xf32>
    %92 = vector.extract_strided_slice %55 {offsets = [7, 0], sizes = [1, 128], strides = [1, 1]} : vector<8x128xf32> to vector<1x128xf32>
    %93 = vector.extract_strided_slice %21 {offsets = [0, 131], sizes = [40, 128], strides = [1, 1]} : vector<40x384xf32> to vector<40x128xf32>
    %94 = vector.broadcast %92 : vector<1x128xf32> to vector<40x128xf32>
    %95 = arith.mulf %94, %93 : vector<40x128xf32>
    %96 = arith.addf %91, %95 : vector<40x128xf32>
    %c0_14 = arith.constant 0 : index
    %c0_15 = arith.constant 0 : index
    %c0_16 = arith.constant 0 : index
    %97 = vector.load %arg6[%c0_14, %c0_15, %c0_16] : memref<1x120x128xf32, #tpu.memory_space<vmem>>, vector<1x40x128xf32>
    %98 = vector.shape_cast %97 : vector<1x40x128xf32> to vector<40x128xf32>
    %99 = vector.shape_cast %22 : vector<40x128xf32> to vector<1x40x128xf32>
    tpu.vector_store %arg6[%c0_14, %c0_15, %c0_16], %99 {strides = array<i32>} : memref<1x120x128xf32, #tpu.memory_space<vmem>>, vector<1x40x128xf32>,
    %c0_17 = arith.constant 0 : index
    %c40 = arith.constant 40 : index
    %c0_18 = arith.constant 0 : index
    %100 = vector.load %arg6[%c0_17, %c40, %c0_18] : memref<1x120x128xf32, #tpu.memory_space<vmem>>, vector<1x40x128xf32>
    %101 = vector.shape_cast %100 : vector<1x40x128xf32> to vector<40x128xf32>
    %102 = vector.shape_cast %54 : vector<40x128xf32> to vector<1x40x128xf32>
    tpu.vector_store %arg6[%c0_17, %c40, %c0_18], %102 {strides = array<i32>} : memref<1x120x128xf32, #tpu.memory_space<vmem>>, vector<1x40x128xf32>,
    %c0_19 = arith.constant 0 : index
    %c80 = arith.constant 80 : index
    %c0_20 = arith.constant 0 : index
    %103 = vector.load %arg6[%c0_19, %c80, %c0_20] : memref<1x120x128xf32, #tpu.memory_space<vmem>>, vector<1x40x128xf32>
    %104 = vector.shape_cast %103 : vector<1x40x128xf32> to vector<40x128xf32>
    %105 = vector.shape_cast %96 : vector<40x128xf32> to vector<1x40x128xf32>
    tpu.vector_store %arg6[%c0_19, %c80, %c0_20], %105 {strides = array<i32>} : memref<1x120x128xf32, #tpu.memory_space<vmem>>, vector<1x40x128xf32>,
    return
  }
  func.func @transform_0(%arg0: i32) -> (i32, i32) {
    %c0_i32 = arith.constant 0 : i32
    %c0_i32_0 = arith.constant 0 : i32
    return %c0_i32, %arg0 : i32, i32
  }
  func.func @transform_1(%arg0: i32) -> (i32, i32) {
    %c0_i32 = arith.constant 0 : i32
    %c0_i32_0 = arith.constant 0 : i32
    %c0_i32_1 = arith.constant 0 : i32
    return %c0_i32, %c0_i32_0 : i32, i32
  }
  func.func @transform_2(%arg0: i32) -> (i32, i32) {
    %c0_i32 = arith.constant 0 : i32
    %c0_i32_0 = arith.constant 0 : i32
    %c0_i32_1 = arith.constant 0 : i32
    return %c0_i32, %c0_i32_0 : i32, i32
  }
  func.func @transform_3(%arg0: i32) -> (i32, i32) {
    %c0_i32 = arith.constant 0 : i32
    %c0_i32_0 = arith.constant 0 : i32
    %c0_i32_1 = arith.constant 0 : i32
    return %c0_i32, %c0_i32_0 : i32, i32
  }
  func.func @transform_4(%arg0: i32) -> (i32, i32) {
    %c0_i32 = arith.constant 0 : i32
    %c0_i32_0 = arith.constant 0 : i32
    %c0_i32_1 = arith.constant 0 : i32
    return %c0_i32, %c0_i32_0 : i32, i32
  }
  func.func @transform_5(%arg0: i32) -> (i32, i32, i32) {
    %c0_i32 = arith.constant 0 : i32
    %c0_i32_0 = arith.constant 0 : i32
    %c0_i32_1 = arith.constant 0 : i32
    return %arg0, %c0_i32, %c0_i32_0 : i32, i32, i32
  }
}

</mosaic_0001>

<bundles_post_ra>
// kernel: tpu_custom_call.1
= control target key start
LH: loop header
LB: loop body
LE: loop exit
PB: predicated region body
PF: predicated region fallthrough
CT: control target
= control target key end

     0   :  { %10 = vsyncpa [#allocation4], 0  ;;  %s2699_s0 = inlined_call_operand.vmem [shape: bf16[96,256], index: 0, kind: input, shape index: {}]   ;;  %s2700_s1 = inlined_call_operand.vmem [shape: bf16[240,96], index: 1, kind: input, shape index: {}]   ;;  %s2701_s2 = inlined_call_operand.vmem [shape: f32[40,1], index: 2, kind: input, shape index: {}]   ;;  %s2702_s3 = inlined_call_operand.vmem [shape: f32[6,128], index: 3, kind: input, shape index: {}]   ;;  %s2703_s4 = inlined_call_operand.vmem [shape: f32[8,128], index: 4, kind: input, shape index: {}]   ;;  %s2704_s5 = inlined_call_operand.hbm [shape: f32[2,120,128], index: 5, kind: output, shape index: {}]  }
   0x1   :  { %12 = vsyncpa [#allocation4 + $0x1], 0  ;;  %s1834_s18 = smov 0   ;;  %s1836_s19 = smov 0  }
   0x2   :  { %s1838_s20 = smov 0   ;;  %s1840_s21 = smov 0  }
   0x3 LB: > { %s1495_s22 = sadd.s32 4294967295, %s1787_s21   ;;  %s1496_s23 = sadd.s32 4294967294, %s1787_s21   ;;  %s1787_s21 = sphi %s1840_s21, %s2712_s21   ;;  %s1783_s20 = sphi %s1838_s20, %s2711_s20   ;;  %s1779_s19 = sphi %s1836_s19, %s2710_s19   ;;  %s1775_s18 = sphi %s1834_s18, %s2709_s18  }
   0x4   : > { %s1857_s24 = sadd.s32 1, %s1787_s21   ;;  %s25_s25 = sadd.s32 1, %s1783_s20 }
   0x5   : > { %s22_s26 = ssub.s32 %s1787_s21, %s1857_s24  ;;  %p32_p0 = scmp.ne.s32.totalorder %s1783_s20, %s1779_s19 }
   0x6   : > { %p23_p1 = scmp.eq.s32.totalorder %s22_s26, 0  ;;  %p33_p2 = scmp.eq.s32.totalorder %s1787_s21, 0 }
   0x7   : > { %p146_p3 = scmp.eq.s32.totalorder %s1495_s22, 1  ;;  %p151_p4 = scmp.ne.s32.totalorder %s1779_s19, %s1775_s18 }
   0x8   : > { %s1870_s27 = scalar_select %p23_p1, %s1783_s20, %s25_s25  }
   0x9   : > { %p34_p5 = por %p33_p2, %p32_p0  ;;  %p1872_p6 = por %p146_p3, %p32_p0 }
   0xa   : > { %p152_p7 = scmp.eq.s32.totalorder %s1496_s23, 1  ;;  %p1498_p9 = scmp.ge.s32.totalorder %s1787_s21, 2 }
   0xc   : > { %p1876_p8 = por %p152_p7, %p151_p4  ;;  %180 = sbr.rel (%p1498_p9) target bundleno = 31 (0x1f), region = 32 }
  0x13   : > { %183 = sbr.rel (!%p34_p5) target bundleno = 31 (0x1f), region = 36  ;;  %s185_s30 = sand.u32 (%p34_p5), 1, %s1783_s20  }
  0x14   : > { %s1499_s6 = sshll.u32 (%p34_p5), %s1787_s21, 2  ;;  %s1645_s7 = smul.u32 (%p34_p5), 48, %s185_s30 }
  0x15   : > { %s189_s10 = scalar_lea.vmem (%p34_p5), %s2699_s0, %s1499_s6 }
  0x16   : > { %v205_v0 = vld [vmem:[%s189_s10] sm:$0xf] (%p34_p5)  ;;  %v207_v1 = vld [vmem:[%s189_s10 + $0x8] sm:$0xf] (%p34_p5)  ;;  %v209_v2 = vld [vmem:[%s189_s10 + $0x10] sm:$0xf] (%p34_p5) }
  0x17   : > { %v211_v3 = vld [vmem:[%s189_s10 + $0x18] sm:$0xf] (%p34_p5)  ;;  %v213_v4 = vld [vmem:[%s189_s10 + $0x20] sm:$0xf] (%p34_p5)  ;;  %s187_s11 = scalar_lea.vmem (%p34_p5), [#allocation2], %s1645_s7 }
  0x18   : > { %206 = vst [vmem:[%s187_s11] sm:$0xf] (%p34_p5), %v205_v0  ;;  %208 = vst [vmem:[%s187_s11 + $0x4] sm:$0xf] (%p34_p5), %v207_v1  ;;  %v215_v5 = vld [vmem:[%s189_s10 + $0x28] sm:$0xf] (%p34_p5) }
  0x19   : > { %210 = vst [vmem:[%s187_s11 + $0x8] sm:$0xf] (%p34_p5), %v209_v2  ;;  %212 = vst [vmem:[%s187_s11 + $0xc] sm:$0xf] (%p34_p5), %v211_v3  ;;  %v217_v6 = vld [vmem:[%s189_s10 + $0x30] sm:$0xf] (%p34_p5) }
  0x1a   : > { %214 = vst [vmem:[%s187_s11 + $0x10] sm:$0xf] %v213_v4  ;;  %v219_v7 = vld [vmem:[%s189_s10 + $0x38] sm:$0xf]  ;;  %216 = vst [vmem:[%s187_s11 + $0x14] sm:$0xf] %v215_v5 }
  0x1b   : > { %218 = vst [vmem:[%s187_s11 + $0x18] sm:$0xf] %v217_v6  ;;  %220 = vst [vmem:[%s187_s11 + $0x1c] sm:$0xf] %v219_v7  ;;  %v221_v8 = vld [vmem:[%s189_s10 + $0x40] sm:$0xf] }
  0x1c   : > { %v223_v9 = vld [vmem:[%s189_s10 + $0x48] sm:$0xf]  ;;  %v225_v10 = vld [vmem:[%s189_s10 + $0x50] sm:$0xf]  ;;  %222 = vst [vmem:[%s187_s11 + $0x20] sm:$0xf] %v221_v8 }
  0x1d   : > { %224 = vst [vmem:[%s187_s11 + $0x24] sm:$0xf] %v223_v9  ;;  %226 = vst [vmem:[%s187_s11 + $0x28] sm:$0xf] %v225_v10  ;;  %v227_v11 = vld [vmem:[%s189_s10 + $0x58] sm:$0xf] }
  0x1e   : > { %228 = vst [vmem:[%s187_s11 + $0x2c] sm:$0xf] %v227_v11 }
  0x1f PF: > { %p1500_p10 = scmp.ge.s32.totalorder %s1787_s21, 1  ;;  %p274_p11 = scmp.lt.s32.totalorder %s1787_s21, 3 }
  0x21   : > { %p275_p12 = pnand %p1500_p10, %p274_p11 }
  0x23   : > { %278 = sbr.rel (%p275_p12) target bundleno = 726 (0x2d6), region = 77 }
  0x2a   : > { %v1789_v12 = vmov 0.0   ;;  %s1790_s12 = smov 127   ;;  %s1894_s13 = sand.u32 1, %s1779_s19   ;;  %v913_v13 = vld [vmem:[%s2701_s2 + $0x8] sm:$0xff]  ;;  %v1791_v14 = vmov 0   ;;  %vm1792_vm0 = vmmov 0  }
  0x2b   : > { %667 = vrot.lane.b32.xlu0 %v1789_v12, %s1790_s12  ;;  %1561 = vmatprep.subr.bf16.mxu0 %v1789_v12  ;;  %s1646_s16 = smul.u32 48, %s1894_s13  ;;  %s1793_s17 = smov 126   ;;  %v914_v16 = vld [vmem:[%s2701_s2 + $0x10] sm:$0xff]  ;;  %v916_v18 = vld [vmem:[%s2701_s2 + $0x20] sm:$0xff]  ;;  %v915_v23 = vld [vmem:[%s2701_s2 + $0x18] sm:$0xff]  ;;  %vm462_vm1 = vcmask 785408  }
  0x2c   : > { %1633 = vmatprep.subr.bf16.mxu1 %v1789_v12  ;;  %1702 = vset.pattern.permute.xlu0 %v1791_v14  ;;  %s1794_s30 = smov 125   ;;  %s1795_s8 = smov 124   ;;  %v912_v21 = vld [vmem:[%s2701_s2] sm:$0xff]  ;;  %v1712_v27 = vld [vmem:[%s2700_s1 + $0x8] sm:$0xff]   ;;  %v1714_v29 = vld [vmem:[%s2700_s1 + $0x10] sm:$0xff]   ;;  %vm829_vm2 = vcmask 1014784  }
  0x2d   : > { %1703 = vset.pattern.permute.xlu1 %v1791_v14  ;;  %1573 = vmatprep.mubr.msk.bf16.mxu0 %vm1792_vm0, %v1789_v12  ;;  %s1907_s23 = scalar_lea.vmem [#allocation2], %s1646_s16  ;;  %s1796_s9 = smov 123   ;;  %v1710_v25 = vld [vmem:[%s2700_s1] sm:$0xff]   ;;  %v1713_v28 = vld [vmem:[%s2700_s1 + $0x48] sm:$0xff]   ;;  %v1715_v30 = vld [vmem:[%s2700_s1 + $0x50] sm:$0xff]   ;;  %vm679_vm3 = vcmask 1039360  }
  0x2e   : > { %924 = vperm.xlu1 %1703, %v913_v13   ;;  %1605 = vmatprep.mubr.msk.bf16.mxu1 %vm1792_vm0, %v1789_v12  ;;  %v1704_v15 = vld [vmem:[%s1907_s23] sm:$0xff]   ;;  %v1705_v17 = vld [vmem:[%s1907_s23 + $0x8] sm:$0xff]   ;;  %v1706_v19 = vld [vmem:[%s1907_s23 + $0x10] sm:$0xff]   ;;  %vm729_vm4 = vcmask 1031168   ;;  %vm779_vm5 = vcmask 1022976   ;;  %vm879_vm6 = vcmask 1006592  }
  0x2f   : > { %717 = vrot.lane.b32.xlu0 %v1789_v12, %s1793_s17  ;;  %1562 = vmatpush3.bf16.msra.mxu0 %v1704_v15  ;;  %v1707_v20 = vld [vmem:[%s1907_s23 + $0x18] sm:$0xff]   ;;  %v1708_v22 = vld [vmem:[%s1907_s23 + $0x20] sm:$0xff]   ;;  %v1709_v24 = vld [vmem:[%s1907_s23 + $0x28] sm:$0xff]   ;;  %s1797_s16 = smov 3   ;;  %s1798_s25 = smov 2   ;;  %vm1052_vm7 = vcmask 15360  }
  0x30   : > { %1639 = vmatpush3.bf16.msra.mxu1 %v1704_v15  ;;  %1563 = vmatprep.subr.bf16.mxu0 %v1789_v12  ;;  %v1711_v26 = vld [vmem:[%s2700_s1 + $0x40] sm:$0xff]   ;;  %v1716_v31 = vld [vmem:[%s2700_s1 + $0x18] sm:$0xff]   ;;  %v1720_v35 = vld [vmem:[%s2700_s1 + $0x28] sm:$0xff]   ;;  %s1799_s26 = smov 1   ;;  %s1800_s6 = smov 4   ;;  %vm1007_vm8 = vcmask 23552  }
  0x31   : > { %1634 = vmatprep.subr.bf16.mxu1 %v1789_v12  ;;  %v1717_v32 = vld [vmem:[%s2700_s1 + $0x58] sm:$0xff]   ;;  %v1718_v33 = vld [vmem:[%s2700_s1 + $0x20] sm:$0xff]   ;;  %v1721_v36 = vld [vmem:[%s2700_s1 + $0x68] sm:$0xff]   ;;  %vm1097_vm9 = vcmask 7168   ;;  %vm1250_vm10 = vcmask 31744  }
  0x32   : > { %929 = vperm.xlu1 %1703, %v914_v16   ;;  %v1719_v34 = vld [vmem:[%s2700_s1 + $0x60] sm:$0xff]   ;;  %v1722_v37 = vld [vmem:[%s2700_s1 + $0x70] sm:$0xff]   ;;  %v1724_v39 = vld [vmem:[%s2700_s1 + $0x38] sm:$0xff]  }
  0x33   : > { %767 = vrot.lane.b32.xlu0 %v1789_v12, %s1794_s30  ;;  %1564 = vmatpush3.bf16.msra.mxu0 %v1705_v17  ;;  %v1723_v38 = vld [vmem:[%s2700_s1 + $0x30] sm:$0xff]  }
  0x34   : > { %1640 = vmatpush3.bf16.msra.mxu1 %v1705_v17  ;;  %1565 = vmatprep.subr.bf16.mxu0 %v1789_v12 }
  0x35   : > { %1635 = vmatprep.subr.bf16.mxu1 %v1789_v12 }
  0x36   : > { %939 = vperm.xlu1 %1703, %v916_v18  }
  0x37   : > { %817 = vrot.lane.b32.xlu0 %v1789_v12, %s1795_s8  ;;  %1566 = vmatpush3.bf16.msra.mxu0 %v1706_v19 }
  0x38   : > { %1641 = vmatpush3.bf16.msra.mxu1 %v1706_v19  ;;  %1567 = vmatprep.subr.bf16.mxu0 %v1789_v12 }
  0x39   : > { %1636 = vmatprep.subr.bf16.mxu1 %v1789_v12 }
  0x3b   : > { %867 = vrot.lane.b32.xlu0 %v1789_v12, %s1796_s9  ;;  %1568 = vmatpush3.bf16.msra.mxu0 %v1707_v20 }
  0x3c   : > { %1642 = vmatpush3.bf16.msra.mxu1 %v1707_v20  ;;  %1569 = vmatprep.subr.bf16.mxu0 %v1789_v12 }
  0x3d   : > { %1637 = vmatprep.subr.bf16.mxu1 %v1789_v12 }
  0x3f   : > { %919 = vperm.xlu0 %1702, %v912_v21   ;;  %1570 = vmatpush3.bf16.msra.mxu0 %v1708_v22 }
  0x40   : > { %1643 = vmatpush3.bf16.msra.mxu1 %v1708_v22  ;;  %1571 = vmatprep.subr.bf16.mxu0 %v1789_v12 }
  0x41   : > { %1638 = vmatprep.subr.bf16.mxu1 %v1789_v12 }
  0x43   : > { %934 = vperm.xlu0 %1702, %v915_v23   ;;  %1572 = vmatpush3.bf16.msra.mxu0 %v1709_v24 }
  0x44   : > { %1644 = vmatpush3.bf16.msra.mxu1 %v1709_v24 }
  0x46   : > { %1574 = vmatmul.mubr.msk.bf16.vlgmr.msra.gmra.mrb[0].mxu0 %vm462_vm1, %v1710_v25 }
  0x47   : > { %1606 = vmatmul.mubr.msk.bf16.vlgmr.msra.gmra.mrb[0].mxu1 %vm462_vm1, %v1711_v26  ;;  %1577 = vmatprep.mubr.msk.bf16.mxu0 %vm1792_vm0, %v1789_v12 }
  0x48   : > { %1609 = vmatprep.mubr.msk.bf16.mxu1 %vm1792_vm0, %v1789_v12 }
  0x4e   : > { %1578 = vmatmul.mubr.msk.bf16.gmra.mrb[4].mxu0 %vm462_vm1, %v1712_v27 }
  0x4f   : > { %1610 = vmatmul.mubr.msk.bf16.gmra.mrb[4].mxu1 %vm462_vm1, %v1713_v28  ;;  %1581 = vmatprep.mubr.msk.bf16.mxu0 %vm1792_vm0, %v1789_v12 }
  0x50   : > { %1613 = vmatprep.mubr.msk.bf16.mxu1 %vm1792_vm0, %v1789_v12 }
  0x56   : > { %1582 = vmatmul.mubr.msk.bf16.gmra.mrb[8].mxu0 %vm462_vm1, %v1714_v29 }
  0x57   : > { %1614 = vmatmul.mubr.msk.bf16.gmra.mrb[8].mxu1 %vm462_vm1, %v1715_v30  ;;  %1585 = vmatprep.mubr.msk.bf16.mxu0 %vm1792_vm0, %v1789_v12 }
  0x58   : > { %1617 = vmatprep.mubr.msk.bf16.mxu1 %vm1792_vm0, %v1789_v12 }
  0x5e   : > { %1586 = vmatmul.mubr.msk.bf16.gmra.mrb[12].mxu0 %vm462_vm1, %v1716_v31 }
  0x5f   : > { %1618 = vmatmul.mubr.msk.bf16.gmra.mrb[12].mxu1 %vm462_vm1, %v1717_v32  ;;  %1589 = vmatprep.mubr.msk.bf16.mxu0 %vm1792_vm0, %v1789_v12 }
  0x60   : > { %1621 = vmatprep.mubr.msk.bf16.mxu1 %vm1792_vm0, %v1789_v12 }
  0x66   : > { %1590 = vmatmul.mubr.msk.bf16.gmra.mrb[16].mxu0 %vm462_vm1, %v1718_v33 }
  0x67   : > { %1622 = vmatmul.mubr.msk.bf16.gmra.mrb[16].mxu1 %vm462_vm1, %v1719_v34  ;;  %1593 = vmatprep.mubr.msk.bf16.mxu0 %vm1792_vm0, %v1789_v12 }
  0x68   : > { %1625 = vmatprep.mubr.msk.bf16.mxu1 %vm1792_vm0, %v1789_v12 }
  0x6e   : > { %1594 = vmatmul.mubr.msk.bf16.gmra.mrb[20].mxu0 %vm462_vm1, %v1720_v35 }
  0x6f   : > { %1626 = vmatmul.mubr.msk.bf16.gmra.mrb[20].mxu1 %vm462_vm1, %v1721_v36  ;;  %1597 = vmatprep.mubr.msk.bf16.mxu0 %vm1792_vm0, %v1789_v12 }
  0x70   : > { %1629 = vmatprep.mubr.msk.bf16.mxu1 %vm1792_vm0, %v1789_v12 }
  0x76   : > { %1598 = vmatmul.mubr.msk.bf16.gmra.mrb[24].mxu0 %vm462_vm1, %v1723_v38 }
  0x77   : > { %1630 = vmatmul.mubr.msk.bf16.gmra.mrb[24].mxu1 %vm462_vm1, %v1722_v37  ;;  %1601 = vmatprep.mubr.msk.bf16.mxu0 %vm1792_vm0, %v1789_v12 }
  0x7e   : > { %1602 = vmatmul.mubr.msk.bf16.gmra.mrb[28].mxu0 %vm462_vm1, %v1724_v39 }
  0x9d   : > { %v2029_v40 = vpop.permute.xlu0 %667 }
  0xa1   : > { %v2031_v41 = vpop.permute.xlu0 %717 }
  0xa2   : > { %v753_v43 = vadd.f32 %v2031_v41, %v2029_v40 }
  0xa5   : > { %v2033_v42 = vpop.permute.xlu0 %767 }
  0xa6   : > { %v803_v45 = vadd.f32 %v2033_v42, %v753_v43 }
  0xa9   : > { %v2037_v44 = vpop.permute.xlu0 %817 }
  0xaa   : > { %v853_v46 = vadd.f32 %v2037_v44, %v803_v45 }
  0xad   : > { %v2041_v47 = vpop.permute.xlu0 %867  ;;  %v2043_v48 = vpop.permute.xlu1 %924 }
  0xae   : > { %v903_v49 = vadd.f32 %v2041_v47, %v853_v46 }
  0xb0   : > { %v947_v52 = vadd.f32 %v2043_v48, %v903_v49 }
  0xb1   : > { %v2050_v53 = vpop.permute.xlu1 %929 }
  0xb2   : > { %v962_v55 = vmax.f32 %v947_v52, 0.0  ;;  %v950_v56 = vadd.f32 %v2050_v53, %v903_v49 }
  0xb4   : > { %v2058_v59 = vmax.f32 %v950_v56, 0.0 }
  0xb5   : > { %v2060_v60 = vpop.permute.xlu1 %939 }
  0xb6   : > { %v956_v62 = vadd.f32 %v2060_v60, %v903_v49 }
  0xb8   : > { %v2069_v63 = vmax.f32 %v956_v62, 0.0 }
  0xbe   : > { %v2046_v50 = vpop.permute.xlu0 %919 }
  0xbf   : > { %v944_v51 = vadd.f32 %v2046_v50, %v903_v49 }
  0xc1   : > { %v959_v54 = vmax.f32 %v944_v51, 0.0 }
  0xc2   : > { %v2054_v57 = vpop.permute.xlu0 %934 }
  0xc3   : > { %1143 = vrot.lane.b32.xlu1 %v959_v54, %s1790_s12  ;;  %v953_v58 = vadd.f32 %v2054_v57, %v903_v49 }
  0xc5   : > { %v2064_v61 = vmax.f32 %v953_v58, 0.0 }
  0xc7   : > { %1147 = vrot.lane.b32.xlu1 %v962_v55, %s1790_s12 }
  0xcb   : > { %1151 = vrot.lane.b32.xlu1 %v2058_v59, %s1790_s12 }
  0xcf   : > { %1155 = vrot.lane.b32.xlu1 %v2064_v61, %s1790_s12 }
  0xd3   : > { %1159 = vrot.lane.b32.xlu1 %v2069_v63, %s1790_s12 }
  0xd7   : > { %1187 = vrot.lane.b32.xlu1 %v959_v54, %s1793_s17 }
  0xdb   : > { %1191 = vrot.lane.b32.xlu1 %v962_v55, %s1793_s17 }
  0xdf   : > { %1195 = vrot.lane.b32.xlu1 %v2058_v59, %s1793_s17 }
  0xe3   : > { %1199 = vrot.lane.b32.xlu1 %v2064_v61, %s1793_s17 }
  0xe7   : > { %1203 = vrot.lane.b32.xlu1 %v2069_v63, %s1793_s17 }
  0xeb   : > { %1361 = vrot.lane.b32.xlu1 %v959_v54, %s1794_s30 }
  0xef   : > { %1365 = vrot.lane.b32.xlu1 %v962_v55, %s1794_s30 }
 0x119   : > { %v2083_v0 = vpop.f32.mrb[0].mxu0 }
 0x11a   : > { %v606_v1 = vpop.f32.mrb[0].mxu1  ;;  %v1575_v2 = vpop.f32.mrb[1].mxu0 }
 0x11b   : > { %771 = vrot.lane.b32.xlu0 %v606_v1, %s1794_s30  ;;  %v1607_v3 = vpop.f32.mrb[1].mxu1  ;;  %v2086_v4 = vpop.f32.mrb[2].mxu0 }
 0x11c   : > { %v609_v5 = vpop.f32.mrb[2].mxu1  ;;  %v1576_v6 = vpop.f32.mrb[3].mxu0 }
 0x11d   : > { %773 = vrot.lane.b32.xlu1 %v609_v5, %s1794_s30  ;;  %v1608_v7 = vpop.f32.mrb[3].mxu1 }
 0x121   : > { %v2089_v8 = vpop.f32.mrb[4].mxu0 }
 0x122   : > { %v614_v9 = vpop.f32.mrb[4].mxu1  ;;  %v1579_v10 = vpop.f32.mrb[5].mxu0 }
 0x123   : > { %775 = vrot.lane.b32.xlu0 %v614_v9, %s1794_s30  ;;  %v1611_v11 = vpop.f32.mrb[5].mxu1  ;;  %v2092_v12 = vpop.f32.mrb[6].mxu0 }
 0x124   : > { %v617_v13 = vpop.f32.mrb[6].mxu1  ;;  %v1580_v14 = vpop.f32.mrb[7].mxu0 }
 0x125   : > { %777 = vrot.lane.b32.xlu1 %v617_v13, %s1794_s30  ;;  %v1612_v15 = vpop.f32.mrb[7].mxu1 }
 0x129   : > { %v2095_v16 = vpop.f32.mrb[8].mxu0 }
 0x12a   : > { %v622_v17 = vpop.f32.mrb[8].mxu1  ;;  %v1583_v18 = vpop.f32.mrb[9].mxu0 }
 0x12b   : > { %819 = vrot.lane.b32.xlu1 %v622_v17, %s1795_s8  ;;  %v1615_v19 = vpop.f32.mrb[9].mxu1  ;;  %v561_v20 = vpop.f32.mrb[10].mxu0 }
 0x12c   : > { %v625_v21 = vpop.f32.mrb[10].mxu1  ;;  %669 = vrot.lane.b32.xlu0 %v561_v20, %s1790_s12  ;;  %v1584_v23 = vpop.f32.mrb[11].mxu0 }
 0x12d   : > { %v1616_v22 = vpop.f32.mrb[11].mxu1 }
 0x130   : > { %821 = vrot.lane.b32.xlu0 %v625_v21, %s1795_s8 }
 0x131   : > { %v566_v24 = vpop.f32.mrb[12].mxu0 }
 0x132   : > { %v630_v25 = vpop.f32.mrb[12].mxu1  ;;  %671 = vrot.lane.b32.xlu1 %v566_v24, %s1790_s12  ;;  %v1587_v27 = vpop.f32.mrb[13].mxu0 }
 0x133   : > { %v1619_v26 = vpop.f32.mrb[13].mxu1  ;;  %v569_v28 = vpop.f32.mrb[14].mxu0 }
 0x134   : > { %v633_v29 = vpop.f32.mrb[14].mxu1  ;;  %v1588_v30 = vpop.f32.mrb[15].mxu0 }
 0x135   : > { %v1620_v31 = vpop.f32.mrb[15].mxu1  ;;  %825 = vrot.lane.b32.xlu0 %v633_v29, %s1795_s8  ;;  %v2112_v7 = vpop.permute.xlu1 %1143 }
 0x136   : > { %823 = vrot.lane.b32.xlu1 %v630_v25, %s1795_s8 }
 0x139   : > { %v574_v32 = vpop.f32.mrb[16].mxu0  ;;  %v2117_v13 = vpop.permute.xlu1 %1147 }
 0x13a   : > { %v638_v33 = vpop.f32.mrb[16].mxu1  ;;  %673 = vrot.lane.b32.xlu1 %v569_v28, %s1790_s12  ;;  %675 = vrot.lane.b32.xlu0 %v574_v32, %s1790_s12  ;;  %v1591_v35 = vpop.f32.mrb[17].mxu0 }
 0x13b   : > { %v1623_v34 = vpop.f32.mrb[17].mxu1  ;;  %v577_v36 = vpop.f32.mrb[18].mxu0 }
 0x13c   : > { %v641_v37 = vpop.f32.mrb[18].mxu1  ;;  %v1592_v38 = vpop.f32.mrb[19].mxu0 }
 0x13d   : > { %v1624_v39 = vpop.f32.mrb[19].mxu1  ;;  %v2120_v15 = vpop.permute.xlu1 %1151 }
 0x13e   : > { %827 = vrot.lane.b32.xlu1 %v638_v33, %s1795_s8  ;;  %s1647_s8 = smul.u32 120, %s1894_s13 }
 0x141   : > { %v582_v43 = vpop.f32.mrb[20].mxu0  ;;  %v2124_v17 = vpop.permute.xlu1 %1155 }
 0x142   : > { %v646_v45 = vpop.f32.mrb[20].mxu1  ;;  %677 = vrot.lane.b32.xlu1 %v577_v36, %s1790_s12  ;;  %v1595_v49 = vpop.f32.mrb[21].mxu0 }
 0x143   : > { %v1627_v46 = vpop.f32.mrb[21].mxu1  ;;  %871 = vrot.lane.b32.xlu0 %v646_v45, %s1796_s9  ;;  %v585_v51 = vpop.f32.mrb[22].mxu0 }
 0x144   : > { %v649_v52 = vpop.f32.mrb[22].mxu1  ;;  %v1596_v54 = vpop.f32.mrb[23].mxu0 }
 0x145   : > { %v1628_v55 = vpop.f32.mrb[23].mxu1  ;;  %v2126_v18 = vpop.permute.xlu1 %1159 }
 0x146   : > { %869 = vrot.lane.b32.xlu1 %v641_v37, %s1796_s9 }
 0x147   : > { %721 = vrot.lane.b32.xlu0 %v585_v51, %s1793_s17 }
 0x149   : > { %v590_v58 = vpop.f32.mrb[24].mxu0  ;;  %v2128_v19 = vpop.permute.xlu1 %1187 }
 0x14a   : > { %v654_v56 = vpop.f32.mrb[24].mxu1  ;;  %719 = vrot.lane.b32.xlu1 %v582_v43, %s1793_s17  ;;  %v1599_v62 = vpop.f32.mrb[25].mxu0 }
 0x14b   : > { %875 = vrot.lane.b32.xlu0 %v654_v56, %s1796_s9  ;;  %v1631_v1 = vpop.f32.mrb[25].mxu1  ;;  %v593_v2 = vpop.f32.mrb[26].mxu0 }
 0x14c   : > { %v657_v3 = vpop.f32.mrb[26].mxu1  ;;  %v1600_v5 = vpop.f32.mrb[27].mxu0 }
 0x14d   : > { %v1632_v6 = vpop.f32.mrb[27].mxu1  ;;  %v2130_v20 = vpop.permute.xlu1 %1191 }
 0x14e   : > { %873 = vrot.lane.b32.xlu1 %v649_v52, %s1796_s9 }
 0x14f   : > { %725 = vrot.lane.b32.xlu0 %v593_v2, %s1793_s17 }
 0x151   : > { %v598_v9 = vpop.f32.mrb[28].mxu0  ;;  %v2132_v21 = vpop.permute.xlu1 %1195 }
 0x152   : > { %723 = vrot.lane.b32.xlu1 %v590_v58, %s1793_s17  ;;  %v1603_v10 = vpop.f32.mrb[29].mxu0 }
 0x153   : > { %v601_v11 = vpop.f32.mrb[30].mxu0 }
 0x154   : > { %v1604_v14 = vpop.f32.mrb[31].mxu0 }
 0x155   : > { %v2134_v22 = vpop.permute.xlu1 %1199 }
 0x156   : > { %877 = vrot.lane.b32.xlu1 %v657_v3, %s1796_s9  ;;  %s2240_s9 = scalar_lea.vmem [#allocation3], %s1647_s8 }
 0x159   : > { %v2136_v23 = vpop.permute.xlu1 %1203 }
 0x15a   : > { %727 = vrot.lane.b32.xlu1 %v598_v9, %s1793_s17 }
 0x15d   : > { %v2138_v24 = vpop.permute.xlu1 %1361 }
 0x15e   : > { %769 = vrot.lane.b32.xlu1 %v601_v11, %s1794_s30  ;;  %2707 = vst [vmem:[#allocation6_spill] sm:$0xff] %v2138_v24 }
 0x161   : > { %v2140_v25 = vpop.permute.xlu1 %1365 }
 0x18d   : > { %v772_v27 = vpop.permute.xlu0 %771 }
 0x18e   : > { %v782_v2 = vsel %vm779_vm5, %v2033_v42, %v772_v27  ;;  %v783_v3 = vsel %vm779_vm5, %v772_v27, %v2033_v42 }
 0x18f   : > { %v2142_v26 = vpop.permute.xlu1 %773 }
 0x195   : > { %v776_v29 = vpop.permute.xlu0 %775 }
 0x197   : > { %v2144_v28 = vpop.permute.xlu1 %777 }
 0x19d   : > { %v2146_v30 = vpop.permute.xlu1 %819 }
 0x19e   : > { %v2151_v31 = vsel %vm829_vm2, %v2037_v44, %v2146_v30  ;;  %v2153_v32 = vpop.permute.xlu0 %669 }
 0x19f   : > { %v680_v5 = vsel %vm679_vm3, %v2029_v40, %v2153_v32 }
 0x1a2   : > { %v822_v34 = vpop.permute.xlu0 %821 }
 0x1a3   : > { %v832_v14 = vsel %vm829_vm2, %v2037_v44, %v822_v34 }
 0x1a4   : > { %v672_v33 = vpop.permute.xlu1 %671 }
 0x1a5   : > { %v683_v49 = vsel %vm679_vm3, %v672_v33, %v2029_v40  ;;  %v682_v55 = vsel %vm679_vm3, %v2029_v40, %v672_v33  ;;  %v833_v33 = vsel %vm829_vm2, %v822_v34, %v2037_v44 }
 0x1a6   : > { %v705_v51 = vadd.f32 %v683_v49, %v2086_v4 }
 0x1a7   : > { %v826_v36 = vpop.permute.xlu0 %825 }
 0x1a8   : > { %v2155_v35 = vpop.permute.xlu1 %823 }
 0x1ac   : > { %v2157_v37 = vpop.permute.xlu1 %673  ;;  %v676_v38 = vpop.permute.xlu0 %675 }
 0x1ad   : > { %v687_v49 = vsel %vm679_vm3, %v676_v38, %v2029_v40  ;;  %v685_v34 = vsel %vm679_vm3, %v2157_v37, %v2029_v40 }
 0x1b0   : > { %v2159_v39 = vpop.permute.xlu1 %827 }
 0x1b1   : > { %v2164_v43 = vsel %vm829_vm2, %v2037_v44, %v2159_v39 }
 0x1b4   : > { %v2166_v46 = vpop.permute.xlu1 %677 }
 0x1b5   : > { %v872_v45 = vpop.permute.xlu0 %871 }
 0x1b8   : > { %v2171_v52 = vpop.permute.xlu1 %869 }
 0x1b9   : > { %v722_v54 = vpop.permute.xlu0 %721  ;;  %v2178_v56 = vsel %vm879_vm6, %v2041_v47, %v2171_v52 }
 0x1ba   : > { %v732_v58 = vsel %vm729_vm4, %v2031_v41, %v722_v54  ;;  %v733_v62 = vsel %vm729_vm4, %v722_v54, %v2031_v41 }
 0x1bb   : > { %v754_v1 = vadd.f32 %v732_v58, %v682_v55  ;;  %v755_v4 = vadd.f32 %v733_v62, %v705_v51  ;;  %v882_v58 = vsel %vm879_vm6, %v2041_v47, %v872_v45  ;;  %v883_v62 = vsel %vm879_vm6, %v872_v45, %v2041_v47 }
 0x1bc   : > { %v2191_v10 = vpop.permute.xlu1 %719 }
 0x1bd   : > { %v804_v6 = vadd.f32 %v782_v2, %v754_v1  ;;  %v805_v9 = vadd.f32 %v783_v3, %v755_v4  ;;  %v2193_v11 = vpop.permute.xlu0 %875  ;;  %v730_v27 = vsel %vm729_vm4, %v2031_v41, %v2191_v10  ;;  %v709_v1 = vadd.f32 %v687_v49, %v2092_v12 }
 0x1be   : > { %v2204_v55 = vadd.f32 %v730_v27, %v680_v5  ;;  %v686_v5 = vsel %vm679_vm3, %v2029_v40, %v676_v38  ;;  %v786_v49 = vsel %vm779_vm5, %v2033_v42, %v776_v29  ;;  %v707_v38 = vadd.f32 %v685_v34, %v2089_v8 }
 0x1bf   : > { %v854_v51 = vadd.f32 %v832_v14, %v804_v6  ;;  %v855_v54 = vadd.f32 %v833_v33, %v805_v9 }
 0x1c0   : > { %v2215_v3 = vpop.permute.xlu1 %873 }
 0x1c1   : > { %v904_v4 = vadd.f32 %v882_v58, %v854_v51  ;;  %v905_v2 = vadd.f32 %v883_v62, %v855_v54  ;;  %v726_v6 = vpop.permute.xlu0 %725  ;;  %v787_v51 = vsel %vm779_vm5, %v776_v29, %v2033_v42 }
 0x1c2   : > { %v736_v9 = vsel %vm729_vm4, %v2031_v41, %v726_v6  ;;  %v737_v45 = vsel %vm729_vm4, %v726_v6, %v2031_v41 }
 0x1c3   : > { %v946_v14 = vadd.f32 %v2043_v48, %v905_v2  ;;  %v758_v33 = vadd.f32 %v736_v9, %v686_v5  ;;  %v759_v27 = vadd.f32 %v737_v45, %v709_v1  ;;  %v945_v12 = vadd.f32 %v2043_v48, %v904_v4 }
 0x1c4   : > { %v724_v24 = vpop.permute.xlu1 %723  ;;  %v836_v1 = vsel %vm829_vm2, %v2037_v44, %v826_v36  ;;  %v837_v48 = vsel %vm829_vm2, %v826_v36, %v2037_v44  ;;  %v785_v36 = vsel %vm779_vm5, %v2142_v26, %v2033_v42  ;;  %v887_v2 = vsel %vm879_vm6, %v2193_v11, %v2041_v47 }
 0x1c5   : > { %v2230_v54 = vmax.f32 %v946_v14, 0.0  ;;  %v808_v58 = vadd.f32 %v786_v49, %v758_v33  ;;  %v809_v62 = vadd.f32 %v787_v51, %v759_v27  ;;  %v2232_v6 = vmax.f32 %v945_v12, 0.0 }
 0x1c6   : > { %v735_v4 = vsel %vm729_vm4, %v724_v24, %v2031_v41  ;;  %v734_v9 = vsel %vm729_vm4, %v2031_v41, %v724_v24  ;;  %v835_v33 = vsel %vm829_vm2, %v2155_v35, %v2037_v44  ;;  %v689_v27 = vsel %vm679_vm3, %v2166_v46, %v2029_v40 }
 0x1c7   : > { %1400 = vst [vmem:[%s2240_s9 + $0x8] sm:$0xff] %v2230_v54  ;;  %v2244_v8 = vadd.f32 %v836_v1, %v808_v58  ;;  %v859_v29 = vadd.f32 %v837_v48, %v809_v62  ;;  %v757_v34 = vadd.f32 %v735_v4, %v707_v38  ;;  %991 = vrot.lane.b32.xlu0 %v2232_v6, %s1797_s16 }
 0x1c8   : > { %993 = vrot.lane.b32.xlu1 %v2230_v54, %s1797_s16  ;;  %v878_v14 = vpop.permute.xlu1 %877  ;;  %v684_v49 = vsel %vm679_vm3, %v2029_v40, %v2157_v37  ;;  %v681_v38 = vsel %vm679_vm3, %v2153_v32, %v2029_v40  ;;  %v885_v58 = vsel %vm879_vm6, %v2215_v3, %v2041_v47  ;;  %v784_v37 = vsel %vm779_vm5, %v2033_v42, %v2142_v26 }
 0x1c9   : > { %v909_v5 = vadd.f32 %v887_v2, %v859_v29  ;;  %v807_v45 = vadd.f32 %v785_v36, %v757_v34  ;;  %v888_v12 = vsel %vm879_vm6, %v2041_v47, %v878_v14  ;;  %v756_v62 = vadd.f32 %v734_v9, %v684_v49 }
 0x1ca   : > { %v711_v1 = vadd.f32 %v689_v27, %v2095_v16  ;;  %v688_v32 = vsel %vm679_vm3, %v2029_v40, %v2166_v46  ;;  %v731_v34 = vsel %vm729_vm4, %v2191_v10, %v2031_v41  ;;  %v702_v16 = vadd.f32 %v681_v38, %v2083_v0 }
 0x1cb   : > { %v952_v51 = vadd.f32 %v2054_v57, %v909_v5  ;;  %v857_v24 = vadd.f32 %v835_v33, %v807_v45  ;;  %1036 = vrot.lane.b32.xlu0 %v2232_v6, %s1798_s25  ;;  %v788_v40 = vsel %vm779_vm5, %v2033_v42, %v2144_v28  ;;  %v806_v0 = vadd.f32 %v784_v37, %v756_v62 }
 0x1cc   : > { %1038 = vrot.lane.b32.xlu1 %v2230_v54, %s1798_s25  ;;  %v728_v29 = vpop.permute.xlu1 %727  ;;  %v752_v46 = vadd.f32 %v731_v34, %v702_v16  ;;  %v834_v49 = vsel %vm829_vm2, %v2037_v44, %v2155_v35  ;;  %v831_v35 = vsel %vm829_vm2, %v2146_v30, %v2037_v44 }
 0x1cd   : > { %v2284_v48 = vmax.f32 %v952_v51, 0.0  ;;  %v907_v4 = vadd.f32 %v885_v58, %v857_v24  ;;  %v738_v36 = vsel %vm729_vm4, %v2031_v41, %v728_v29  ;;  %v739_v26 = vsel %vm729_vm4, %v728_v29, %v2031_v41 }
 0x1ce   : > { %v760_v5 = vadd.f32 %v738_v36, %v688_v32  ;;  %v761_v9 = vadd.f32 %v739_v26, %v711_v1  ;;  %v789_v41 = vsel %vm779_vm5, %v2144_v28, %v2033_v42  ;;  %v839_v51 = vsel %vm829_vm2, %v2159_v39, %v2037_v44 }
 0x1cf   : > { %1402 = vst [vmem:[%s2240_s9 + $0x18] sm:$0xff] %v2284_v48  ;;  %v949_v2 = vadd.f32 %v2050_v53, %v907_v4  ;;  %1081 = vrot.lane.b32.xlu0 %v2232_v6, %s1799_s26  ;;  %v856_v39 = vadd.f32 %v834_v49, %v806_v0 }
 0x1d0   : > { %1083 = vrot.lane.b32.xlu1 %v2230_v54, %s1799_s26  ;;  %v810_v45 = vadd.f32 %v788_v40, %v760_v5  ;;  %v811_v33 = vadd.f32 %v789_v41, %v761_v9  ;;  %v770_v27 = vpop.permute.xlu1 %769  ;;  %v972_v5 = vld [vmem:[%s2702_s3] sm:$0x3f] }
 0x1d1   : > { %v2310_v10 = vmax.f32 %v949_v2, 0.0  ;;  %v780_v28 = vsel %vm779_vm5, %v2033_v42, %v770_v27  ;;  %v781_v24 = vsel %vm779_vm5, %v770_v27, %v2033_v42  ;;  %v889_v42 = vsel %vm879_vm6, %v878_v14, %v2041_v47 }
 0x1d2   : > { %v860_v38 = vadd.f32 %v2164_v43, %v810_v45  ;;  %v861_v58 = vadd.f32 %v839_v51, %v811_v33  ;;  %v801_v62 = vadd.f32 %v780_v28, %v2204_v55  ;;  %v802_v37 = vadd.f32 %v781_v24, %v752_v46  ;;  %v1225_v51 = vld [vmem:[%s2703_s4] sm:$0xff] }
 0x1d3   : > { %1401 = vst [vmem:[%s2240_s9 + $0x10] sm:$0xff] %v2310_v10  ;;  %1234 = vrot.lane.b32.xlu0 %v2232_v6, %s1800_s6  ;;  %v881_v6 = vsel %vm879_vm6, %v2171_v52, %v2041_v47  ;;  %v884_v14 = vsel %vm879_vm6, %v2041_v47, %v2215_v3 }
 0x1d4   : > { %1236 = vrot.lane.b32.xlu1 %v2230_v54, %s1800_s6  ;;  %v910_v43 = vadd.f32 %v888_v12, %v860_v38  ;;  %v911_v1 = vadd.f32 %v889_v42, %v861_v58  ;;  %v851_v55 = vadd.f32 %v2151_v31, %v801_v62  ;;  %v852_v4 = vadd.f32 %v831_v35, %v802_v37 }
 0x1d5   : > { %v906_v31 = vadd.f32 %v884_v14, %v856_v39 }
 0x1d6   : > { %v955_v44 = vadd.f32 %v2060_v60, %v911_v1  ;;  %v901_v30 = vadd.f32 %v2178_v56, %v851_v55  ;;  %v902_v29 = vadd.f32 %v881_v6, %v852_v4 }
 0x1d7   : > { %1145 = vrot.lane.b32.xlu0 %v2230_v54, %s1790_s12  ;;  %v948_v56 = vadd.f32 %v2050_v53, %v906_v31  ;;  %v886_v53 = vsel %vm879_vm6, %v2041_v47, %v2193_v11 }
 0x1d8   : > { %997 = vrot.lane.b32.xlu1 %v2310_v10, %s1797_s16  ;;  %v2348_v12 = vmax.f32 %v955_v44, 0.0  ;;  %v943_v52 = vadd.f32 %v2046_v50, %v902_v29  ;;  %v908_v34 = vadd.f32 %v886_v53, %v2244_v8  ;;  %v954_v8 = vadd.f32 %v2060_v60, %v910_v43 }
 0x1d9   : > { %v963_v3 = vmax.f32 %v948_v56, 0.0 }
 0x1da   : > { %1403 = vst [vmem:[%s2240_s9 + $0x20] sm:$0xff] %v2348_v12  ;;  %v2353_v32 = vmax.f32 %v943_v52, 0.0  ;;  %v951_v36 = vadd.f32 %v2054_v57, %v908_v34  ;;  %v942_v57 = vadd.f32 %v2046_v50, %v901_v30  ;;  %v969_v26 = vmax.f32 %v954_v8, 0.0 }
 0x1db   : > { %1189 = vrot.lane.b32.xlu0 %v2230_v54, %s1793_s17  ;;  %v973_v50 = vlaneseq }
 0x1dc   : > { %1042 = vrot.lane.b32.xlu1 %v2310_v10, %s1798_s25  ;;  %1399 = vst [vmem:[%s2240_s9] sm:$0xff] %v2353_v32  ;;  %v966_v47 = vmax.f32 %v951_v36, 0.0  ;;  %v957_v11 = vmax.f32 %v942_v57, 0.0 }
 0x1df   : > { %1363 = vrot.lane.b32.xlu0 %v2230_v54, %s1794_s30 }
 0x1e0   : > { %1087 = vrot.lane.b32.xlu1 %v2310_v10, %s1799_s26 }
 0x1e3   : > { %995 = vrot.lane.b32.xlu0 %v963_v3, %s1797_s16 }
 0x1e4   : > { %1240 = vrot.lane.b32.xlu1 %v2310_v10, %s1800_s6 }
 0x1e7   : > { %1040 = vrot.lane.b32.xlu0 %v963_v3, %s1798_s25 }
 0x1e8   : > { %1001 = vrot.lane.b32.xlu1 %v2284_v48, %s1797_s16 }
 0x1eb   : > { %1085 = vrot.lane.b32.xlu0 %v963_v3, %s1799_s26 }
 0x1ec   : > { %1046 = vrot.lane.b32.xlu1 %v2284_v48, %s1798_s25 }
 0x1ef   : > { %1238 = vrot.lane.b32.xlu0 %v963_v3, %s1800_s6 }
 0x1f0   : > { %1091 = vrot.lane.b32.xlu1 %v2284_v48, %s1799_s26 }
 0x1f3   : > { %1149 = vrot.lane.b32.xlu0 %v2310_v10, %s1790_s12 }
 0x1f4   : > { %1244 = vrot.lane.b32.xlu1 %v2284_v48, %s1800_s6 }
 0x1f7   : > { %1193 = vrot.lane.b32.xlu0 %v2310_v10, %s1793_s17 }
 0x1f8   : > { %989 = vrot.lane.b32.xlu1 %v2353_v32, %s1797_s16 }
 0x1fb   : > { %1367 = vrot.lane.b32.xlu0 %v2310_v10, %s1794_s30 }
 0x1fc   : > { %1005 = vrot.lane.b32.xlu1 %v2348_v12, %s1797_s16 }
 0x1ff   : > { %999 = vrot.lane.b32.xlu0 %v966_v47, %s1797_s16 }
 0x200   : > { %1034 = vrot.lane.b32.xlu1 %v2353_v32, %s1798_s25 }
 0x203   : > { %1044 = vrot.lane.b32.xlu0 %v966_v47, %s1798_s25 }
 0x204   : > { %1050 = vrot.lane.b32.xlu1 %v2348_v12, %s1798_s25 }
 0x207   : > { %1089 = vrot.lane.b32.xlu0 %v966_v47, %s1799_s26 }
 0x208   : > { %1079 = vrot.lane.b32.xlu1 %v2353_v32, %s1799_s26 }
 0x20b   : > { %1242 = vrot.lane.b32.xlu0 %v966_v47, %s1800_s6 }
 0x20c   : > { %1095 = vrot.lane.b32.xlu1 %v2348_v12, %s1799_s26 }
 0x20f   : > { %1153 = vrot.lane.b32.xlu0 %v2284_v48, %s1790_s12 }
 0x210   : > { %1232 = vrot.lane.b32.xlu1 %v2353_v32, %s1800_s6 }
 0x213   : > { %1197 = vrot.lane.b32.xlu0 %v2284_v48, %s1793_s17 }
 0x214   : > { %1248 = vrot.lane.b32.xlu1 %v2348_v12, %s1800_s6 }
 0x217   : > { %987 = vrot.lane.b32.xlu0 %v957_v11, %s1797_s16 }
 0x218   : > { %1369 = vrot.lane.b32.xlu1 %v2058_v59, %s1794_s30 }
 0x21b   : > { %1003 = vrot.lane.b32.xlu0 %v969_v26, %s1797_s16  ;;  %s1801_s16 = smov [#allocation3]  }
 0x21c   : > { %1373 = vrot.lane.b32.xlu1 %v2064_v61, %s1794_s30  ;;  %v2433_v61 = vshrl.u32 %v973_v50, 7 }
 0x21e   : > { %v1030_v16 = vsub.s32 1, %v2433_v61  ;;  %v1075_v41 = vsub.s32 2, %v2433_v61  ;;  %v1120_v24 = vsub.s32 3, %v2433_v61  ;;  %v1134_v42 = vsub.s32 4, %v2433_v61 }
 0x21f   : > { %1032 = vrot.lane.b32.xlu0 %v957_v11, %s1798_s25  ;;  %v1183_v31 = vsub.s32 5, %v2433_v61  ;;  %v1343_v57 = vsub.s32 6, %v2433_v61  ;;  %v1357_v50 = vsub.s32 7, %v2433_v61 }
 0x220   : > { %1377 = vrot.lane.b32.xlu1 %v2069_v63, %s1794_s30  ;;  %v975_v63 = vsub.s32 0, %v2433_v61  ;;  %v2442_v40 = vrot.slane %v972_v5, %v1030_v16  ;;  %v2450_v33 = vrot.slane %v972_v5, %v1075_v41  ;;  %v2461_v58 = vrot.slane %v1225_v51, %v1030_v16 }
 0x221   : > { %v2468_v43 = vrot.slane %v1225_v51, %v1075_v41  ;;  %v2470_v4 = vrot.slane %v972_v5, %v1120_v24  ;;  %v2475_v44 = vrot.slane %v972_v5, %v1134_v42  ;;  %v2478_v29 = vrot.slane %v1225_v51, %v1120_v24 }
 0x222   : > { %v2448_v46 = vrot.slane %v972_v5, %v975_v63  ;;  %v2463_v62 = vrot.slane %v1225_v51, %v975_v63  ;;  %v2482_v56 = vrot.slane %v1225_v51, %v1134_v42  ;;  %v2497_v63 = vrot.slane %v1225_v51, %v1183_v31 }
 0x223   : > { %1048 = vrot.lane.b32.xlu0 %v969_v26, %s1798_s25  ;;  %v2501_v41 = vrot.slane %v1225_v51, %v1343_v57  ;;  %s1729_s25 = sshll.u32 %s1801_s16, 4  ;;  %s1730_s25 = int_to_ptr.vmem [resolvable:$false] %s1729_s25 }
 0x227   : > { %1077 = vrot.lane.b32.xlu0 %v957_v11, %s1799_s26 }
 0x22b   : > { %1093 = vrot.lane.b32.xlu0 %v969_v26, %s1799_s26  ;;  %s1731_s26 = scalar_lea.vmem %s1730_s25, 3840 }
 0x22f   : > { %1141 = vrot.lane.b32.xlu0 %v2353_v32, %s1790_s12 }
 0x233   : > { %1230 = vrot.lane.b32.xlu0 %v957_v11, %s1800_s6  ;;  %v1123_v11 = vmul.f32 %v2470_v4, %v2230_v54 }
 0x237   : > { %1246 = vrot.lane.b32.xlu0 %v969_v26, %s1800_s6  ;;  %v2493_v26 = vrot.slane %v972_v5, %v1183_v31 }
 0x239   : > { %v992_v59 = vpop.permute.xlu0 %991 }
 0x23a   : > { %v994_v60 = vpop.permute.xlu1 %993 }
 0x23b   : > { %1371 = vrot.lane.b32.xlu0 %v2284_v48, %s1794_s30  ;;  %v1009_v27 = vsel %vm1007_vm8, %v992_v59, %v994_v60 }
 0x23c   : > { %v1019_v37 = vmul.f32 %v1009_v27, %v2448_v46  ;;  %v1276_v30 = vmul.f32 %v2461_v58, %v1009_v27  ;;  %v2508_v27 = vrot.slane %v1225_v51, %v1357_v50 }
 0x23d   : > { %v1037_v2 = vpop.permute.xlu0 %1036 }
 0x23e   : > { %v1039_v9 = vpop.permute.xlu1 %1038 }
 0x23f   : > { %1157 = vrot.lane.b32.xlu0 %v2348_v12, %s1790_s12  ;;  %v1054_v0 = vsel %vm1052_vm7, %v1037_v2, %v1039_v9  ;;  %v1318_v2 = vmul.f32 %v2482_v56, %v2230_v54  ;;  %s1648_s12 = smul.u32 1920, %s1495_s22  ;;  %s1415_s22 = scalar_lea.sflag [#allocation4], %s1894_s13 }
 0x240   : > { %v1064_v28 = vmul.f32 %v1054_v0, %v2442_v40  ;;  %v1290_v53 = vmul.f32 %v2468_v43, %v1054_v0 }
 0x241   : > { %v1082_v45 = vpop.permute.xlu0 %1081  ;;  %s2652_s15 = scalar_lea.hbm %s2704_s5, %s1648_s12 }
 0x242   : > { %v1084_v49 = vpop.permute.xlu1 %1083  ;;  %v1069_v55 = vadd.f32 %v1064_v28, %v1019_v37 }
 0x243   : > { %v1099_v38 = vsel %vm1097_vm9, %v1082_v45, %v1084_v49  ;;  %1185 = vrot.lane.b32.xlu0 %v2353_v32, %s1793_s17 }
 0x244   : > { %v1109_v35 = vmul.f32 %v1099_v38, %v2450_v33  ;;  %v1304_v59 = vmul.f32 %v2478_v29, %v1099_v38 }
 0x245   : > { %v1235_v39 = vpop.permute.xlu0 %1234 }
 0x246   : > { %v1237_v1 = vpop.permute.xlu1 %1236  ;;  %v1114_v52 = vadd.f32 %v1109_v35, %v1069_v55 }
 0x247   : > { %v1252_v6 = vsel %vm1250_vm10, %v1235_v39, %v1237_v1  ;;  %1201 = vrot.lane.b32.xlu0 %v2348_v12, %s1793_s17  ;;  %s1428_s17 = sshll.u32 %s2240_s9, 4  ;;  %s2654_s17 = int_to_ptr.vmem [resolvable:$true] %s1428_s17 }
 0x248   : > { %v1262_v14 = vmul.f32 %v1252_v6, %v2463_v62  ;;  %s1725_s8 = scalar_lea.vmem %s2654_s17, 1920  ;;  %p1732_p2 = scmp.lt.s32.totalorder %s2654_s17, %s1730_s25 }
 0x249   : > { %v1146_v3 = vpop.permute.xlu0 %1145  ;;  %p1726_p13 = scmp.ne.s32.totalorder %s2654_s17, %s1725_s8  ;;  %p1733_p3 = scmp.lt.s32.totalorder %s1731_s26, %s1725_s8 }
 0x24a   : > { %v1281_v34 = vadd.f32 %v1276_v30, %v1262_v14  ;;  %v1162_v36 = vsel %vm679_vm3, %v1146_v3, %v2117_v13  ;;  %v998_v47 = vpop.permute.xlu1 %997  ;;  %v1128_v13 = vadd.f32 %v1123_v11, %v1114_v52 }
 0x24b   : > { %v1172_v8 = vmul.f32 %v1162_v36, %v2475_v44  ;;  %1359 = vrot.lane.b32.xlu0 %v2353_v32, %s1794_s30  ;;  %v1332_v54 = vmul.f32 %v2497_v63, %v1162_v36  ;;  %p1727_p0 = pnand %p1726_p13, %p1872_p6  ;;  %p1734_p4 = por %p1733_p3, %p1732_p2 }
 0x24c   : > { %v1295_v60 = vadd.f32 %v1290_v53, %v1281_v34 }
 0x24d   : > { %v1190_v16 = vpop.permute.xlu0 %1189  ;;  %v1177_v45 = vadd.f32 %v1172_v8, %v1128_v13  ;;  %p1728_p1 = pneg %p1727_p0 }
 0x24e   : > { %v1309_v9 = vadd.f32 %v1304_v59, %v1295_v60  ;;  %v1206_v5 = vsel %vm729_vm4, %v1190_v16, %v2130_v20  ;;  %v1043_v0 = vpop.permute.xlu1 %1042 }
 0x24f   : > { %v1216_v61 = vmul.f32 %v1206_v5, %v2493_v26  ;;  %1375 = vrot.lane.b32.xlu0 %v2348_v12, %s1794_s30  ;;  %v1346_v37 = vmul.f32 %v2501_v41, %v1206_v5  ;;  %p1735_p5 = pnand %p1734_p4, %p1728_p1 }
 0x250   : > { %v1323_v49 = vadd.f32 %v1318_v2, %v1309_v9 }
 0x251   : > { %v1221_v28 = vadd.f32 %v1216_v61, %v1177_v45  ;;  %v1364_v24 = vpop.permute.xlu0 %1363 }
 0x252   : > { %v1337_v38 = vadd.f32 %v1332_v54, %v1323_v49  ;;  %v1380_v20 = vsel %vm779_vm5, %v1364_v24, %v2140_v25  ;;  %v1088_v35 = vpop.permute.xlu1 %1087 }
 0x253   : > { %1405 = vst [vmem:[%s2240_s9 + $0x30] sm:$0xff] %v1221_v28  ;;  %v1390_v39 = vmul.f32 %v1380_v20, %v2508_v27 }
 0x254   : > { %v1351_v42 = vadd.f32 %v1346_v37, %v1337_v38 }
 0x255   : > { %v996_v1 = vpop.permute.xlu0 %995 }
 0x256   : > { %v1395_v55 = vadd.f32 %v1390_v39, %v1351_v42  ;;  %v1241_v51 = vpop.permute.xlu1 %1240  ;;  %v1010_v52 = vsel %vm1007_vm8, %v996_v1, %v998_v47  ;;  %v1124_v47 = vmul.f32 %v2470_v4, %v2310_v10 }
 0x257   : > { %v1020_v34 = vmul.f32 %v1010_v52, %v2448_v46 }
 0x258   : > { %1410 = vst [vmem:[%s2240_s9 + $0x58] sm:$0xff] %v1395_v55 }
 0x259   : > { %v1041_v6 = vpop.permute.xlu0 %1040 }
 0x25a   : > { %v1002_v30 = vpop.permute.xlu1 %1001  ;;  %v1055_v14 = vsel %vm1052_vm7, %v1041_v6, %v1043_v0 }
 0x25b   : > { %v1065_v25 = vmul.f32 %v1055_v14, %v2442_v40  ;;  %v1291_v55 = vmul.f32 %v2468_v43, %v1055_v14 }
 0x25d   : > { %v1086_v31 = vpop.permute.xlu0 %1085  ;;  %v1070_v8 = vadd.f32 %v1065_v25, %v1020_v34 }
 0x25e   : > { %v1100_v3 = vsel %vm1097_vm9, %v1086_v31, %v1088_v35  ;;  %v1047_v53 = vpop.permute.xlu1 %1046  ;;  %v1277_v35 = vmul.f32 %v2461_v58, %v1010_v52 }
 0x25f   : > { %v1110_v36 = vmul.f32 %v1100_v3, %v2450_v33 }
 0x261   : > { %v1239_v57 = vpop.permute.xlu0 %1238  ;;  %v1115_v50 = vadd.f32 %v1110_v36, %v1070_v8 }
 0x262   : > { %v1092_v11 = vpop.permute.xlu1 %1091  ;;  %v1253_v28 = vsel %vm1250_vm10, %v1239_v57, %v1241_v51 }
 0x263   : > { %v1129_v2 = vadd.f32 %v1124_v47, %v1115_v50  ;;  %v1263_v37 = vmul.f32 %v1253_v28, %v2463_v62 }
 0x265   : > { %v1150_v59 = vpop.permute.xlu0 %1149  ;;  %v1282_v39 = vadd.f32 %v1277_v35, %v1263_v37 }
 0x266   : > { %v1163_v60 = vsel %vm679_vm3, %v1150_v59, %v2120_v15  ;;  %v2525_v13 = vpop.permute.xlu1 %1244 }
 0x267   : > { %v1173_v16 = vmul.f32 %v1163_v60, %v2475_v44  ;;  %v1296_v34 = vadd.f32 %v1291_v55, %v1282_v39 }
 0x269   : > { %v1194_v9 = vpop.permute.xlu0 %1193  ;;  %v1178_v45 = vadd.f32 %v1173_v16, %v1129_v2  ;;  %v1125_v2 = vmul.f32 %v2470_v4, %v2284_v48 }
 0x26a   : > { %v1207_v5 = vsel %vm729_vm4, %v1194_v9, %v2132_v21  ;;  %v2532_v0 = vpop.permute.xlu1 %989 }
 0x26b   : > { %v1217_v61 = vmul.f32 %v1207_v5, %v2493_v26  ;;  %v1347_v39 = vmul.f32 %v2501_v41, %v1207_v5 }
 0x26d   : > { %v1222_v49 = vadd.f32 %v1217_v61, %v1178_v45  ;;  %v1368_v54 = vpop.permute.xlu0 %1367 }
 0x26e   : > { %v2535_v15 = vpop.permute.xlu1 %1005 }
 0x26f   : > { %1406 = vst [vmem:[%s2240_s9 + $0x38] sm:$0xff] %v1222_v49  ;;  %v1333_v49 = vmul.f32 %v2497_v63, %v1163_v60 }
 0x271   : > { %v1000_v24 = vpop.permute.xlu0 %999 }
 0x272   : > { %v1035_v38 = vpop.permute.xlu1 %1034  ;;  %v1011_v6 = vsel %vm1007_vm8, %v1000_v24, %v1002_v30 }
 0x273   : > { %v1021_v36 = vmul.f32 %v1011_v6, %v2448_v46 }
 0x275   : > { %v1045_v20 = vpop.permute.xlu0 %1044 }
 0x276   : > { %v1051_v21 = vpop.permute.xlu1 %1050  ;;  %v1056_v42 = vsel %vm1052_vm7, %v1045_v20, %v1047_v53  ;;  %v1305_v53 = vmul.f32 %v2478_v29, %v1100_v3 }
 0x277   : > { %v1066_v25 = vmul.f32 %v1056_v42, %v2442_v40 }
 0x278   : > { %v1310_v14 = vadd.f32 %v1305_v53, %v1296_v34 }
 0x279   : > { %v1090_v1 = vpop.permute.xlu0 %1089  ;;  %v1071_v50 = vadd.f32 %v1066_v25, %v1021_v36 }
 0x27a   : > { %v2545_v31 = vsel %vm1097_vm9, %v1090_v1, %v1092_v11  ;;  %v1080_v51 = vpop.permute.xlu1 %1079  ;;  %v1319_v11 = vmul.f32 %v2482_v56, %v2310_v10 }
 0x27b   : > { %v1111_v52 = vmul.f32 %v2545_v31, %v2450_v33 }
 0x27c   : > { %v1324_v9 = vadd.f32 %v1319_v11, %v1310_v14 }
 0x27d   : > { %v1243_v57 = vpop.permute.xlu0 %1242  ;;  %v1116_v59 = vadd.f32 %v1111_v52, %v1071_v50 }
 0x27e   : > { %v1096_v8 = vpop.permute.xlu1 %1095  ;;  %v1338_v37 = vadd.f32 %v1333_v49, %v1324_v9  ;;  %v1254_v52 = vsel %vm1250_vm10, %v1243_v57, %v2525_v13  ;;  %v1122_v49 = vmul.f32 %v2470_v4, %v2353_v32 }
 0x27f   : > { %v1130_v45 = vadd.f32 %v1125_v2, %v1116_v59  ;;  %v1264_v14 = vmul.f32 %v1254_v52, %v2463_v62  ;;  %v1278_v59 = vmul.f32 %v2461_v58, %v1011_v6 }
 0x280   : > { %v1352_v60 = vadd.f32 %v1347_v39, %v1338_v37 }
 0x281   : > { %v1154_v30 = vpop.permute.xlu0 %1153 }
 0x282   : > { %v2556_v47 = vsel %vm679_vm3, %v1154_v30, %v2124_v17  ;;  %v1233_v16 = vpop.permute.xlu1 %1232 }
 0x283   : > { %v1174_v3 = vmul.f32 %v2556_v47, %v2475_v44 }
 0x285   : > { %v1198_v61 = vpop.permute.xlu0 %1197  ;;  %v1179_v28 = vadd.f32 %v1174_v3, %v1130_v45  ;;  %v1283_v3 = vadd.f32 %v1278_v59, %v1264_v14  ;;  %v1292_v45 = vmul.f32 %v2468_v43, %v1056_v42 }
 0x286   : > { %v2565_v10 = vsel %vm729_vm4, %v1198_v61, %v2134_v22  ;;  %v1249_v17 = vpop.permute.xlu1 %1248 }
 0x287   : > { %v1218_v24 = vmul.f32 %v2565_v10, %v2493_v26 }
 0x289   : > { %v1223_v20 = vadd.f32 %v1218_v24, %v1179_v28  ;;  %v988_v35 = vpop.permute.xlu0 %987  ;;  %v1297_v28 = vadd.f32 %v1292_v45, %v1283_v3 }
 0x28a   : > { %v1370_v1 = vpop.permute.xlu1 %1369  ;;  %v1008_v5 = vsel %vm1007_vm8, %v988_v35, %v2532_v0 }
 0x28b   : > { %1407 = vst [vmem:[%s2240_s9 + $0x40] sm:$0xff] %v1223_v20  ;;  %v1381_v55 = vsel %vm779_vm5, %v1368_v54, %v1370_v1  ;;  %v1018_v11 = vmul.f32 %v1008_v5, %v2448_v46  ;;  %v1320_v1 = vmul.f32 %v2482_v56, %v2284_v48 }
 0x28c   : > { %v1391_v25 = vmul.f32 %v1381_v55, %v2508_v27 }
 0x28d   : > { %v1004_v34 = vpop.permute.xlu0 %1003 }
 0x28e   : > { %v1396_v22 = vadd.f32 %v1391_v25, %v1352_v60  ;;  %v1012_v13 = vsel %vm1007_vm8, %v1004_v34, %v2535_v15 }
 0x28f   : > { %v1022_v6 = vmul.f32 %v1012_v13, %v2448_v46  ;;  %v1126_v46 = vmul.f32 %v2470_v4, %v2348_v12  ;;  %v1279_v48 = vmul.f32 %v2461_v58, %v1012_v13 }
 0x290   : > { %1411 = vst [vmem:[%s2240_s9 + $0x60] sm:$0xff] %v1396_v22 }
 0x291   : > { %v1033_v36 = vpop.permute.xlu0 %1032 }
 0x292   : > { %v1053_v53 = vsel %vm1052_vm7, %v1033_v36, %v1035_v38 }
 0x293   : > { %v1063_v54 = vmul.f32 %v1053_v53, %v2442_v40  ;;  %v1289_v34 = vmul.f32 %v2468_v43, %v1053_v53 }
 0x295   : > { %v1049_v50 = vpop.permute.xlu0 %1048  ;;  %v1068_v57 = vadd.f32 %v1063_v54, %v1018_v11  ;;  %v1374_v54 = vpop.permute.xlu1 %1373 }
 0x296   : > { %v1057_v30 = vsel %vm1052_vm7, %v1049_v50, %v1051_v21 }
 0x297   : > { %v1067_v9 = vmul.f32 %v1057_v30, %v2442_v40  ;;  %v1306_v40 = vmul.f32 %v2478_v29, %v2545_v31  ;;  %v1334_v31 = vmul.f32 %v2497_v63, %v2556_v47  ;;  %v1293_v47 = vmul.f32 %v2468_v43, %v1057_v30 }
 0x298   : > { %v1321_v30 = vmul.f32 %v2482_v56, %v2348_v12 }
 0x299   : > { %v1078_v2 = vpop.permute.xlu0 %1077  ;;  %v1072_v15 = vadd.f32 %v1067_v9, %v1022_v6  ;;  %v1311_v42 = vadd.f32 %v1306_v40, %v1297_v28  ;;  %v2708_v40 = vld [vmem:[#allocation6_spill] sm:$0xff] }
 0x29a   : > { %v1098_v38 = vsel %vm1097_vm9, %v1078_v2, %v1080_v51 }
 0x29b   : > { %v1108_v0 = vmul.f32 %v1098_v38, %v2450_v33  ;;  %v1325_v60 = vadd.f32 %v1320_v1, %v1311_v42  ;;  %v1303_v50 = vmul.f32 %v2478_v29, %v1098_v38 }
 0x29d   : > { %v1113_v61 = vadd.f32 %v1108_v0, %v1068_v57  ;;  %v1094_v21 = vpop.permute.xlu0 %1093  ;;  %v1339_v36 = vadd.f32 %v1334_v31, %v1325_v60 }
 0x29e   : > { %v1102_v24 = vsel %vm1097_vm9, %v1094_v21, %v1096_v8 }
 0x29f   : > { %v1112_v51 = vmul.f32 %v1102_v24, %v2450_v33  ;;  %v1127_v37 = vadd.f32 %v1122_v49, %v1113_v61  ;;  %v1275_v33 = vmul.f32 %v2461_v58, %v1008_v5  ;;  %v1348_v5 = vmul.f32 %v2501_v41, %v2565_v10 }
 0x2a0   : > { %v1307_v3 = vmul.f32 %v2478_v29, %v1102_v24 }
 0x2a1   : > { %v1117_v20 = vadd.f32 %v1112_v51, %v1072_v15  ;;  %v1142_v35 = vpop.permute.xlu0 %1141  ;;  %v1353_v2 = vadd.f32 %v1348_v5, %v1339_v36 }
 0x2a2   : > { %v1161_v10 = vsel %vm679_vm3, %v1142_v35, %v2112_v7 }
 0x2a3   : > { %v1131_v39 = vadd.f32 %v1126_v46, %v1117_v20  ;;  %v1331_v28 = vmul.f32 %v2497_v63, %v1161_v10 }
 0x2a5   : > { %v1231_v55 = vpop.permute.xlu0 %1230 }
 0x2a6   : > { %v1251_v8 = vsel %vm1250_vm10, %v1231_v55, %v1233_v16 }
 0x2a7   : > { %v1261_v25 = vmul.f32 %v1251_v8, %v2463_v62 }
 0x2a9   : > { %v1280_v22 = vadd.f32 %v1275_v33, %v1261_v25  ;;  %v1247_v4 = vpop.permute.xlu0 %1246 }
 0x2aa   : > { %v1255_v52 = vsel %vm1250_vm10, %v1247_v4, %v1249_v17  ;;  %v1317_v17 = vmul.f32 %v2482_v56, %v2353_v32  ;;  %v1171_v32 = vmul.f32 %v1161_v10, %v2475_v44 }
 0x2ab   : > { %v1294_v14 = vadd.f32 %v1289_v34, %v1280_v22  ;;  %v1265_v16 = vmul.f32 %v1255_v52, %v2463_v62 }
 0x2ac   : > { %v1176_v61 = vadd.f32 %v1171_v32, %v1127_v37 }
 0x2ad   : > { %v1308_v59 = vadd.f32 %v1303_v50, %v1294_v14  ;;  %v1284_v53 = vadd.f32 %v1279_v48, %v1265_v16  ;;  %v1372_v11 = vpop.permute.xlu0 %1371 }
 0x2ae   : > { %v1382_v58 = vsel %vm779_vm5, %v1372_v11, %v1374_v54 }
 0x2af   : > { %v1298_v13 = vadd.f32 %v1293_v47, %v1284_v53  ;;  %v1392_v62 = vmul.f32 %v1382_v58, %v2508_v27  ;;  %v1322_v38 = vadd.f32 %v1317_v17, %v1308_v59 }
 0x2b1   : > { %v1397_v43 = vadd.f32 %v1392_v62, %v1353_v2  ;;  %v1158_v57 = vpop.permute.xlu0 %1157  ;;  %v1312_v9 = vadd.f32 %v1307_v3, %v1298_v13  ;;  %v1336_v15 = vadd.f32 %v1331_v28, %v1322_v38 }
 0x2b2   : > { %v1165_v29 = vsel %vm679_vm3, %v1158_v57, %v2126_v18 }
 0x2b3   : > { %1412 = vst [vmem:[%s2240_s9 + $0x68] sm:$0xff] %v1397_v43  ;;  %v1326_v0 = vadd.f32 %v1321_v30, %v1312_v9  ;;  %v1175_v7 = vmul.f32 %v1165_v29, %v2475_v44  ;;  %v1335_v44 = vmul.f32 %v2497_v63, %v1165_v29 }
 0x2b5   : > { %v1186_v45 = vpop.permute.xlu0 %1185  ;;  %v1180_v24 = vadd.f32 %v1175_v7, %v1131_v39  ;;  %v1340_v63 = vadd.f32 %v1335_v44, %v1326_v0 }
 0x2b6   : > { %v1205_v6 = vsel %vm729_vm4, %v1186_v45, %v2128_v19 }
 0x2b7   : > { %v1215_v21 = vmul.f32 %v1205_v6, %v2493_v26  ;;  %v1345_v18 = vmul.f32 %v2501_v41, %v1205_v6 }
 0x2b9   : > { %v1220_v12 = vadd.f32 %v1215_v21, %v1176_v61  ;;  %v1202_v56 = vpop.permute.xlu0 %1201  ;;  %v1350_v35 = vadd.f32 %v1345_v18, %v1336_v15 }
 0x2ba   : > { %v1209_v49 = vsel %vm729_vm4, %v1202_v56, %v2136_v23 }
 0x2bb   : > { %1404 = vst [vmem:[%s2240_s9 + $0x28] sm:$0xff] %v1220_v12  ;;  %v1219_v19 = vmul.f32 %v1209_v49, %v2493_v26  ;;  %v1349_v23 = vmul.f32 %v2501_v41, %v1209_v49  ;;  %v1378_v26 = vpop.permute.xlu1 %1377 }
 0x2bd   : > { %v1224_v51 = vadd.f32 %v1219_v19, %v1180_v24  ;;  %v1360_v37 = vpop.permute.xlu0 %1359  ;;  %v1354_v55 = vadd.f32 %v1349_v23, %v1340_v63 }
 0x2be   : > { %v1379_v20 = vsel %vm779_vm5, %v1360_v37, %v2708_v40 }
 0x2bf   : > { %1408 = vst [vmem:[%s2240_s9 + $0x48] sm:$0xff] %v1224_v51  ;;  %v1389_v46 = vmul.f32 %v1379_v20, %v2508_v27 }
 0x2c1   : > { %v1394_v42 = vadd.f32 %v1389_v46, %v1350_v35  ;;  %v1376_v39 = vpop.permute.xlu0 %1375 }
 0x2c2   : > { %v1383_v1 = vsel %vm779_vm5, %v1376_v39, %v1378_v26 }
 0x2c3   : > { %1409 = vst [vmem:[%s2240_s9 + $0x50] sm:$0xff] %v1394_v42  ;;  %v1393_v60 = vmul.f32 %v1383_v1, %v2508_v27 }
 0x2c5   : > { %v1398_v41 = vadd.f32 %v1393_v60, %v1354_v55 }
 0x2c7   : > { %1413 = vst [vmem:[%s2240_s9 + $0x70] sm:$0xff] %v1398_v41 }
 0x2c8   : > { %1738 = shalt.err (!%p1735_p5)
}
 0x2c9   : > { %s1739_s9 = scalar_lea.hbm %s2652_s15, 1920  ;;  %s1743_s7 = scalar_lea.hbm %s2704_s5, 3840 }
 0x2ca   : > { %p1740_p7 = scmp.ne.s32.totalorder %s2652_s15, %s1739_s9  ;;  %p1744_p12 = scmp.lt.u32.totalorder %s2652_s15, %s2704_s5 }
 0x2cb   : > { %p1745_p13 = scmp.lt.u32.totalorder %s1743_s7, %s1739_s9  ;;  %p1747_p1 = scmp.lt.u32.totalorder %s1739_s9, %s2652_s15 }
 0x2cc   : > { %p1741_p10 = pnand %p1740_p7, %p1872_p6 }
 0x2cd   : > { %p1746_p0 = por %p1745_p13, %p1744_p12 }
 0x2ce   : > { %p1742_p11 = pneg %p1741_p10 }
 0x2cf   : > { %p1748_p2 = por %p1747_p1, %p1746_p0 }
 0x2d1   : > { %p1749_p3 = pnand %p1748_p2, %p1742_p11 }
 0x2d3   : > { %1752 = shalt.err (!%p1749_p3)
}
 0x2d4   : > { %s1802_s12 = smov 128   ;;  %s1803_s30 = smov 8  }
 0x2d5   : > { %1649 = dma.vmem_to_hbm [thread:$0]  (%p1872_p6), %s2654_s17, 1920, %s2652_s15, %s1415_s22, %s1802_s12, %s1802_s12, %s1803_s30  }
 0x2d6 PF: > { %s1443_s14 = sand.u32 1, %s1775_s18   ;;  %p1652_p4 = pnand %p1498_p9, %p1876_p8 }
 0x2d7   : > { %s1444_s8 = scalar_lea.sflag [#allocation4], %s1443_s14 }
 0x2d8   : > { %1770 = dma.done.wait (!%p1652_p4), %s1444_s8, 1920  }
 0x2d9   : > { %1772 = vsyncadd (!%p1652_p4), %s1444_s8, 4294965376  ;;  %p15_p5 = scmp.ge.s32.totalorder %s1857_s24, 4   ;;  %s2709_s18 = smov %s1779_s19 }
 0x2da   : > { %s2710_s19 = smov %s1783_s20  ;;  %s2711_s20 = smov %s1870_s27 }
 0x2db   : > { %s2712_s21 = smov %s1857_s24  ;;  %17 = sbr.rel (!%p15_p5) target bundleno = 3 (0x3), region = 121 }
 0x2e2   :  { %1449 = vsyncpa [#allocation4], 1 }
 0x2e3   :  { %1451 = vsyncpa [#allocation4 + $0x1], 1 }

</bundles_post_ra>
